<compile_context>
chip_gen: v5e
topology: v5e:2x2
jax: 0.10.0
libtpu: 0.0.40
codegen_flags: <defaults>
</compile_context>

<pallas_src>
import jax
import jax.numpy as jnp
from jax.experimental import pallas as pl
from jax.experimental.pallas import tpu as pltpu


_IN_OUT = 784  # 28*28; equals the full array dim -> valid last block dim


def _round_up(x, m):
    return ((x + m - 1) // m) * m


def _autoencoder_kernel(x_ref,
                        w1, b1, w2, b2, w34, b34, w5, b5, w6, b6,
                        o_ref):
    """One batch tile: 5 fused matmuls (bottleneck pair pre-folded).

    bf16 operands on the MXU, f32 accumulation / bias / activations.
    """

    def linear(h, w_ref, b_ref):
        return (jnp.dot(h.astype(jnp.bfloat16), w_ref[...],
                        preferred_element_type=jnp.float32)
                + b_ref[...])

    h = x_ref[...]                                   # (TB, 784) f32 (cast below)
    # encoder: 784 -> 256 -> 128
    h = jnp.maximum(linear(h, w1, b1), 0.0)
    h = jnp.maximum(linear(h, w2, b2), 0.0)
    # folded bottleneck pair: Linear(128,64) ; Linear(64,128), no ReLU between
    #   x@W3+b3 then @W4+b4  ==  x@(W3@W4) + (b3@W4 + b4)
    h = jnp.maximum(linear(h, w34, b34), 0.0)
    # decoder tail: 128 -> 256 -> 784
    h = jnp.maximum(linear(h, w5, b5), 0.0)
    h = linear(h, w6, b6)                            # f32 logits
    # sigmoid = 1 / (1 + exp(-h)): exp + approx reciprocal both on the EUP.
    o_ref[...] = pl.reciprocal(1.0 + jnp.exp(-h), approx=True).astype(o_ref.dtype)


def init_params(key):
    """Deterministic PyTorch-style init: U(-1/sqrt(fan_in), 1/sqrt(fan_in))."""
    sizes = [(784, 256), (256, 128), (128, 64),
             (64, 128), (128, 256), (256, 784)]
    params = []
    for (fan_in, fan_out) in sizes:
        key, kw, kb = jax.random.split(key, 3)
        bound = 1.0 / jnp.sqrt(jnp.float32(fan_in))
        w = jax.random.uniform(kw, (fan_in, fan_out), jnp.float32,
                               minval=-bound, maxval=bound)
        b = jax.random.uniform(kb, (1, fan_out), jnp.float32,
                               minval=-bound, maxval=bound)
        params += [w, b]
    return params


def _prepare_params(params):
    """Fold the activation-free bottleneck pair and cast weights to bf16."""
    w1, b1, w2, b2, w3, b3, w4, b4, w5, b5, w6, b6 = params
    # Exact fold (no nonlinearity between the two linears), done in f32:
    w34 = w3 @ w4                        # (128, 64) @ (64, 128) -> (128, 128)
    b34 = b3 @ w4 + b4                   # (1, 128)
    ws = [w1, w2, w34, w5, w6]
    bs = [b1, b2, b34, b5, b6]
    prepped = []
    for w, b in zip(ws, bs):
        prepped += [w.astype(jnp.bfloat16), b.astype(jnp.float32)]
    return prepped


def autoencoder_forward(x_nchw, params, *, batch_tile=512):
    # x.view(-1, 784); keep f32 -- the bf16 cast happens inside the kernel.
    x2d = x_nchw.reshape(-1, _IN_OUT)
    B = x2d.shape[0]

    # Batch tile: multiple of 16 (bf16 sublane packing for the output block),
    # capped at batch_tile, and capped at half the batch when possible so the
    # grid has >= 2 steps (v7x megacore + x/out double buffering).
    b_align = _round_up(B, 16)
    tb = min(batch_tile, b_align)
    if b_align >= 32:
        tb = min(tb, _round_up(b_align // 2, 16))
    b_pad = _round_up(B, tb)
    if b_pad != B:
        x2d = jnp.pad(x2d, ((0, b_pad - B), (0, 0)))

    p = _prepare_params(params)

    grid = (b_pad // tb,)
    x_spec = pl.BlockSpec((tb, _IN_OUT), lambda i: (i, 0))
    out_spec = pl.BlockSpec((tb, _IN_OUT), lambda i: (i, 0))
    # Weights/biases: full-array blocks with constant block index ->
    # DMA'd once and kept resident in VMEM across all batch-grid steps.
    param_specs = [pl.BlockSpec(q.shape, lambda i: (0, 0)) for q in p]

    param_bytes = sum(int(q.size) * q.dtype.itemsize for q in p)
    cost = pl.CostEstimate(
        flops=2 * b_pad * (784 * 256 + 256 * 128 + 128 * 128
                           + 128 * 256 + 256 * 784),
        transcendentals=b_pad * _IN_OUT,
        bytes_accessed=b_pad * _IN_OUT * 4      # x (f32)
                       + b_pad * _IN_OUT * 2    # out (bf16)
                       + param_bytes,
    )

    out = pl.pallas_call(
        _autoencoder_kernel,
        out_shape=jax.ShapeDtypeStruct((b_pad, _IN_OUT), jnp.bfloat16),
        grid=grid,
        in_specs=[x_spec] + param_specs,
        out_specs=out_spec,
        compiler_params=pltpu.CompilerParams(
            dimension_semantics=("parallel",),
            vmem_limit_bytes=32 << 20,
        ),
        cost_estimate=cost,
    )(x2d, *p)

    return out[:B]


def reference_forward(x_nchw, params):
    """Plain-JAX f32 reference (unfused, unfolded) for sanity checking."""
    h = x_nchw.reshape(-1, _IN_OUT).astype(jnp.float32)
    w1, b1, w2, b2, w3, b3, w4, b4, w5, b5, w6, b6 = params
    h = jnp.maximum(h @ w1 + b1, 0.0)
    h = jnp.maximum(h @ w2 + b2, 0.0)
    h = h @ w3 + b3
    h = jnp.maximum(h @ w4 + b4, 0.0)
    h = jnp.maximum(h @ w5 + b5, 0.0)
    h = h @ w6 + b6
    return jax.nn.sigmoid(h)


if __name__ == "__main__":
    key = jax.random.PRNGKey(0)
    k_x, k_p = jax.random.split(key)

    # Small example input consistent with x.view(-1, 784): (B, 1, 28, 28)
    x = jax.random.normal(k_x, (8, 1, 28, 28), dtype=jnp.float32)
    params = init_params(k_p)

    out = autoencoder_forward(x, params)
    out = jax.block_until_ready(out)

    ref = reference_forward(x, params)
    assert out.shape == (8, 784)
    # bf16 matmul operands + bf16 output store + approx reciprocal -> relaxed
    # tolerance vs the f32 reference.
    err = float(jnp.max(jnp.abs(out.astype(jnp.float32) - ref)))
    assert jnp.allclose(out.astype(jnp.float32), ref, atol=3e-2), err

    print("KERNEL_OK")
</pallas_src>

<mosaic_0001>
module attributes {stable_mosaic.version = 11 : i64} {
  func.func @_autoencoder_kernel(%arg0: i32, %arg1: memref<16x784xf32, #tpu.memory_space<vmem>>, %arg2: memref<784x256xbf16, #tpu.memory_space<vmem>>, %arg3: memref<1x256xf32, #tpu.memory_space<vmem>>, %arg4: memref<256x128xbf16, #tpu.memory_space<vmem>>, %arg5: memref<1x128xf32, #tpu.memory_space<vmem>>, %arg6: memref<128x128xbf16, #tpu.memory_space<vmem>>, %arg7: memref<1x128xf32, #tpu.memory_space<vmem>>, %arg8: memref<128x256xbf16, #tpu.memory_space<vmem>>, %arg9: memref<1x256xf32, #tpu.memory_space<vmem>>, %arg10: memref<256x784xbf16, #tpu.memory_space<vmem>>, %arg11: memref<1x784xf32, #tpu.memory_space<vmem>>, %arg12: memref<16x784xbf16, #tpu.memory_space<vmem>>) attributes {dimension_semantics = [#tpu.dimension_semantics<parallel>], iteration_bounds = array<i64: 1>, scalar_prefetch = 0 : i64, scratch_operands = 0 : i64, tpu.core_type = #tpu.core_type<tc>, window_params = [{transform_indices = @transform_0, window_bounds = array<i64: 16, 784>}, {pipeline_mode = #tpu.pipeline_mode<synchronous>, transform_indices = @transform_1, window_bounds = array<i64: 784, 256>}, {pipeline_mode = #tpu.pipeline_mode<synchronous>, transform_indices = @transform_2, window_bounds = array<i64: 1, 256>}, {pipeline_mode = #tpu.pipeline_mode<synchronous>, transform_indices = @transform_3, window_bounds = array<i64: 256, 128>}, {pipeline_mode = #tpu.pipeline_mode<synchronous>, transform_indices = @transform_4, window_bounds = array<i64: 1, 128>}, {pipeline_mode = #tpu.pipeline_mode<synchronous>, transform_indices = @transform_5, window_bounds = array<i64: 128, 128>}, {pipeline_mode = #tpu.pipeline_mode<synchronous>, transform_indices = @transform_6, window_bounds = array<i64: 1, 128>}, {pipeline_mode = #tpu.pipeline_mode<synchronous>, transform_indices = @transform_7, window_bounds = array<i64: 128, 256>}, {pipeline_mode = #tpu.pipeline_mode<synchronous>, transform_indices = @transform_8, window_bounds = array<i64: 1, 256>}, {pipeline_mode = #tpu.pipeline_mode<synchronous>, transform_indices = @transform_9, window_bounds = array<i64: 256, 784>}, {pipeline_mode = #tpu.pipeline_mode<synchronous>, transform_indices = @transform_10, window_bounds = array<i64: 1, 784>}, {transform_indices = @transform_11, window_bounds = array<i64: 16, 784>}]} {
    %c0 = arith.constant 0 : index
    %c0_0 = arith.constant 0 : index
    %0 = vector.load %arg1[%c0, %c0_0] : memref<16x784xf32, #tpu.memory_space<vmem>>, vector<16x784xf32>
    %1 = arith.truncf %0 : vector<16x784xf32> to vector<16x784xbf16>
    %c0_1 = arith.constant 0 : index
    %c0_2 = arith.constant 0 : index
    %2 = vector.load %arg2[%c0_1, %c0_2] : memref<784x256xbf16, #tpu.memory_space<vmem>>, vector<784x256xbf16>
    %cst = arith.constant dense<0.000000e+00> : vector<16x256xf32>
    %3 = tpu.matmul %1, %2, %cst {dimension_numbers = #tpu.dot_dimension_numbers<[1], [0], [0], [1], [0, 0, 1, 1], [], []>} : vector<16x784xbf16>, vector<784x256xbf16>, vector<16x256xf32> -> vector<16x256xf32>
    %c0_3 = arith.constant 0 : index
    %c0_4 = arith.constant 0 : index
    %4 = vector.load %arg3[%c0_3, %c0_4] : memref<1x256xf32, #tpu.memory_space<vmem>>, vector<1x256xf32>
    %5 = vector.broadcast %4 : vector<1x256xf32> to vector<16x256xf32>
    %6 = arith.addf %3, %5 : vector<16x256xf32>
    %cst_5 = arith.constant 0.000000e+00 : f32
    %7 = vector.broadcast %cst_5 : f32 to vector<16x256xf32>
    %8 = arith.maximumf %6, %7 : vector<16x256xf32>
    %9 = arith.truncf %8 : vector<16x256xf32> to vector<16x256xbf16>
    %c0_6 = arith.constant 0 : index
    %c0_7 = arith.constant 0 : index
    %10 = vector.load %arg4[%c0_6, %c0_7] : memref<256x128xbf16, #tpu.memory_space<vmem>>, vector<256x128xbf16>
    %cst_8 = arith.constant dense<0.000000e+00> : vector<16x128xf32>
    %11 = tpu.matmul %9, %10, %cst_8 {dimension_numbers = #tpu.dot_dimension_numbers<[1], [0], [0], [1], [0, 0, 1, 1], [], []>} : vector<16x256xbf16>, vector<256x128xbf16>, vector<16x128xf32> -> vector<16x128xf32>
    %c0_9 = arith.constant 0 : index
    %c0_10 = arith.constant 0 : index
    %12 = vector.load %arg5[%c0_9, %c0_10] : memref<1x128xf32, #tpu.memory_space<vmem>>, vector<1x128xf32>
    %13 = vector.broadcast %12 : vector<1x128xf32> to vector<16x128xf32>
    %14 = arith.addf %11, %13 : vector<16x128xf32>
    %cst_11 = arith.constant 0.000000e+00 : f32
    %15 = vector.broadcast %cst_11 : f32 to vector<16x128xf32>
    %16 = arith.maximumf %14, %15 : vector<16x128xf32>
    %17 = arith.truncf %16 : vector<16x128xf32> to vector<16x128xbf16>
    %c0_12 = arith.constant 0 : index
    %c0_13 = arith.constant 0 : index
    %18 = vector.load %arg6[%c0_12, %c0_13] : memref<128x128xbf16, #tpu.memory_space<vmem>>, vector<128x128xbf16>
    %cst_14 = arith.constant dense<0.000000e+00> : vector<16x128xf32>
    %19 = tpu.matmul %17, %18, %cst_14 {dimension_numbers = #tpu.dot_dimension_numbers<[1], [0], [0], [1], [0, 0, 1, 1], [], []>} : vector<16x128xbf16>, vector<128x128xbf16>, vector<16x128xf32> -> vector<16x128xf32>
    %c0_15 = arith.constant 0 : index
    %c0_16 = arith.constant 0 : index
    %20 = vector.load %arg7[%c0_15, %c0_16] : memref<1x128xf32, #tpu.memory_space<vmem>>, vector<1x128xf32>
    %21 = vector.broadcast %20 : vector<1x128xf32> to vector<16x128xf32>
    %22 = arith.addf %19, %21 : vector<16x128xf32>
    %cst_17 = arith.constant 0.000000e+00 : f32
    %23 = vector.broadcast %cst_17 : f32 to vector<16x128xf32>
    %24 = arith.maximumf %22, %23 : vector<16x128xf32>
    %25 = arith.truncf %24 : vector<16x128xf32> to vector<16x128xbf16>
    %c0_18 = arith.constant 0 : index
    %c0_19 = arith.constant 0 : index
    %26 = vector.load %arg8[%c0_18, %c0_19] : memref<128x256xbf16, #tpu.memory_space<vmem>>, vector<128x256xbf16>
    %cst_20 = arith.constant dense<0.000000e+00> : vector<16x256xf32>
    %27 = tpu.matmul %25, %26, %cst_20 {dimension_numbers = #tpu.dot_dimension_numbers<[1], [0], [0], [1], [0, 0, 1, 1], [], []>} : vector<16x128xbf16>, vector<128x256xbf16>, vector<16x256xf32> -> vector<16x256xf32>
    %c0_21 = arith.constant 0 : index
    %c0_22 = arith.constant 0 : index
    %28 = vector.load %arg9[%c0_21, %c0_22] : memref<1x256xf32, #tpu.memory_space<vmem>>, vector<1x256xf32>
    %29 = vector.broadcast %28 : vector<1x256xf32> to vector<16x256xf32>
    %30 = arith.addf %27, %29 : vector<16x256xf32>
    %cst_23 = arith.constant 0.000000e+00 : f32
    %31 = vector.broadcast %cst_23 : f32 to vector<16x256xf32>
    %32 = arith.maximumf %30, %31 : vector<16x256xf32>
    %33 = arith.truncf %32 : vector<16x256xf32> to vector<16x256xbf16>
    %c0_24 = arith.constant 0 : index
    %c0_25 = arith.constant 0 : index
    %34 = vector.load %arg10[%c0_24, %c0_25] : memref<256x784xbf16, #tpu.memory_space<vmem>>, vector<256x784xbf16>
    %cst_26 = arith.constant dense<0.000000e+00> : vector<16x784xf32>
    %35 = tpu.matmul %33, %34, %cst_26 {dimension_numbers = #tpu.dot_dimension_numbers<[1], [0], [0], [1], [0, 0, 1, 1], [], []>} : vector<16x256xbf16>, vector<256x784xbf16>, vector<16x784xf32> -> vector<16x784xf32>
    %c0_27 = arith.constant 0 : index
    %c0_28 = arith.constant 0 : index
    %36 = vector.load %arg11[%c0_27, %c0_28] : memref<1x784xf32, #tpu.memory_space<vmem>>, vector<1x784xf32>
    %37 = vector.broadcast %36 : vector<1x784xf32> to vector<16x784xf32>
    %38 = arith.addf %35, %37 : vector<16x784xf32>
    %cst_29 = arith.constant 0.000000e+00 : f32
    %39 = vector.broadcast %cst_29 : f32 to vector<16x784xf32>
    %40 = arith.subf %39, %38 : vector<16x784xf32>
    %41 = math.exp %40 : vector<16x784xf32>
    %cst_30 = arith.constant 1.000000e+00 : f32
    %42 = vector.broadcast %cst_30 : f32 to vector<16x784xf32>
    %43 = arith.addf %42, %41 : vector<16x784xf32>
    %44 = tpu.reciprocal %43 {approx = true} : vector<16x784xf32> -> vector<16x784xf32>
    %45 = arith.truncf %44 : vector<16x784xf32> to vector<16x784xbf16>
    %c0_31 = arith.constant 0 : index
    %c0_32 = arith.constant 0 : index
    %46 = vector.load %arg12[%c0_31, %c0_32] : memref<16x784xbf16, #tpu.memory_space<vmem>>, vector<16x784xbf16>
    tpu.vector_store %arg12[%c0_31, %c0_32], %45 {strides = array<i32>} : memref<16x784xbf16, #tpu.memory_space<vmem>>, vector<16x784xbf16>,
    return
  }
  func.func @transform_0(%arg0: i32) -> (i32, i32) {
    %c0_i32 = arith.constant 0 : i32
    %c0_i32_0 = arith.constant 0 : i32
    return %arg0, %c0_i32 : i32, i32
  }
  func.func @transform_1(%arg0: i32) -> (i32, i32) {
    %c0_i32 = arith.constant 0 : i32
    %c0_i32_0 = arith.constant 0 : i32
    %c0_i32_1 = arith.constant 0 : i32
    return %c0_i32, %c0_i32_0 : i32, i32
  }
  func.func @transform_2(%arg0: i32) -> (i32, i32) {
    %c0_i32 = arith.constant 0 : i32
    %c0_i32_0 = arith.constant 0 : i32
    %c0_i32_1 = arith.constant 0 : i32
    return %c0_i32, %c0_i32_0 : i32, i32
  }
  func.func @transform_3(%arg0: i32) -> (i32, i32) {
    %c0_i32 = arith.constant 0 : i32
    %c0_i32_0 = arith.constant 0 : i32
    %c0_i32_1 = arith.constant 0 : i32
    return %c0_i32, %c0_i32_0 : i32, i32
  }
  func.func @transform_4(%arg0: i32) -> (i32, i32) {
    %c0_i32 = arith.constant 0 : i32
    %c0_i32_0 = arith.constant 0 : i32
    %c0_i32_1 = arith.constant 0 : i32
    return %c0_i32, %c0_i32_0 : i32, i32
  }
  func.func @transform_5(%arg0: i32) -> (i32, i32) {
    %c0_i32 = arith.constant 0 : i32
    %c0_i32_0 = arith.constant 0 : i32
    %c0_i32_1 = arith.constant 0 : i32
    return %c0_i32, %c0_i32_0 : i32, i32
  }
  func.func @transform_6(%arg0: i32) -> (i32, i32) {
    %c0_i32 = arith.constant 0 : i32
    %c0_i32_0 = arith.constant 0 : i32
    %c0_i32_1 = arith.constant 0 : i32
    return %c0_i32, %c0_i32_0 : i32, i32
  }
  func.func @transform_7(%arg0: i32) -> (i32, i32) {
    %c0_i32 = arith.constant 0 : i32
    %c0_i32_0 = arith.constant 0 : i32
    %c0_i32_1 = arith.constant 0 : i32
    return %c0_i32, %c0_i32_0 : i32, i32
  }
  func.func @transform_8(%arg0: i32) -> (i32, i32) {
    %c0_i32 = arith.constant 0 : i32
    %c0_i32_0 = arith.constant 0 : i32
    %c0_i32_1 = arith.constant 0 : i32
    return %c0_i32, %c0_i32_0 : i32, i32
  }
  func.func @transform_9(%arg0: i32) -> (i32, i32) {
    %c0_i32 = arith.constant 0 : i32
    %c0_i32_0 = arith.constant 0 : i32
    %c0_i32_1 = arith.constant 0 : i32
    return %c0_i32, %c0_i32_0 : i32, i32
  }
  func.func @transform_10(%arg0: i32) -> (i32, i32) {
    %c0_i32 = arith.constant 0 : i32
    %c0_i32_0 = arith.constant 0 : i32
    %c0_i32_1 = arith.constant 0 : i32
    return %c0_i32, %c0_i32_0 : i32, i32
  }
  func.func @transform_11(%arg0: i32) -> (i32, i32) {
    %c0_i32 = arith.constant 0 : i32
    %c0_i32_0 = arith.constant 0 : i32
    return %arg0, %c0_i32 : i32, i32
  }
}

</mosaic_0001>

<bundles_post_ra>
// kernel: tpu_custom_call.1
= control target key start
LH: loop header
LB: loop body
LE: loop exit
PB: predicated region body
PF: predicated region fallthrough
CT: control target
= control target key end

     0   :  { %vm655_vm0 = vcmask 130048   ;;  %s5217_s0 = inlined_call_operand.vmem [shape: f32[16,784], index: 0, kind: input, shape index: {}]   ;;  %s5218_s1 = inlined_call_operand.vmem [shape: bf16[784,256], index: 1, kind: input, shape index: {}]   ;;  %s5219_s2 = inlined_call_operand.vmem [shape: f32[1,256], index: 2, kind: input, shape index: {}]   ;;  %s5220_s3 = inlined_call_operand.vmem [shape: bf16[256,128], index: 3, kind: input, shape index: {}]   ;;  %s5221_s4 = inlined_call_operand.vmem [shape: f32[1,128], index: 4, kind: input, shape index: {}]   ;;  %s5222_s5 = inlined_call_operand.vmem [shape: bf16[128,128], index: 5, kind: input, shape index: {}]   ;;  %s5223_s6 = inlined_call_operand.vmem [shape: f32[1,128], index: 6, kind: input, shape index: {}]   ;;  %s5224_s7 = inlined_call_operand.vmem [shape: bf16[128,256], index: 7, kind: input, shape index: {}]   ;;  %s5225_s8 = inlined_call_operand.vmem [shape: f32[1,256], index: 8, kind: input, shape index: {}]   ;;  %s5226_s9 = inlined_call_operand.vmem [shape: bf16[256,784], index: 9, kind: input, shape index: {}]   ;;  %s5227_s10 = inlined_call_operand.vmem [shape: f32[1,784], index: 10, kind: input, shape index: {}]   ;;  %s5228_s11 = inlined_call_operand.hbm [shape: bf16[16,784], index: 11, kind: output, shape index: {}]  }
   0x1   :  { %v2324_v0 = vld [vmem:[%s5218_s1 + $0x70] sm:$0xf]  ;;  %v3283_v1 = vld [vmem:[%s5218_s1 + $0x74] sm:$0xf0]  ;;  %v2316_v11 = vld [vmem:[%s5218_s1 + $0x60] sm:$0xf] }
   0x2   :  { %v2452_v2 = vld [vmem:[%s5218_s1 + $0x170] sm:$0xf]  ;;  %v2325_v3 = vor.u32 %v3283_v1, %v2324_v0  ;;  %v3315_v4 = vld [vmem:[%s5218_s1 + $0x174] sm:$0xf0]  ;;  %v3281_v13 = vld [vmem:[%s5218_s1 + $0x64] sm:$0xf0] }
   0x3   :  { %v2516_v5 = vld [vmem:[%s5218_s1 + $0x1f0] sm:$0xf]  ;;  %v3331_v6 = vld [vmem:[%s5218_s1 + $0x1f4] sm:$0xf0]  ;;  %v2453_v7 = vor.u32 %v3315_v4, %v2452_v2  ;;  %v2444_v14 = vld [vmem:[%s5218_s1 + $0x160] sm:$0xf]  ;;  %v2317_v16 = vor.u32 %v3281_v13, %v2316_v11 }
   0x4   :  { %v2517_v8 = vor.u32 %v3331_v6, %v2516_v5  ;;  %v2388_v9 = vld [vmem:[%s5218_s1 + $0xf0] sm:$0xf]  ;;  %v3299_v10 = vld [vmem:[%s5218_s1 + $0xf4] sm:$0xf0]  ;;  %659 = vmatpush.bf16.msra.mxu0 %v2325_v3  ;;  %v3313_v15 = vld [vmem:[%s5218_s1 + $0x164] sm:$0xf0] }
   0x5   :  { %v2389_v12 = vor.u32 %v3299_v10, %v2388_v9  ;;  %687 = vmatpush.bf16.msra.mxu2 %v2453_v7  ;;  %v2445_v17 = vor.u32 %v3313_v15, %v2444_v14  ;;  %v2508_v18 = vld [vmem:[%s5218_s1 + $0x1e0] sm:$0xf]  ;;  %v3329_v19 = vld [vmem:[%s5218_s1 + $0x1e4] sm:$0xf0]  ;;  %v2308_v23 = vld [vmem:[%s5218_s1 + $0x50] sm:$0xf] }
   0x6   :  { %701 = vmatpush.bf16.msra.mxu3 %v2517_v8  ;;  %v2380_v20 = vld [vmem:[%s5218_s1 + $0xe0] sm:$0xf]  ;;  %v2509_v21 = vor.u32 %v3329_v19, %v2508_v18  ;;  %v3297_v22 = vld [vmem:[%s5218_s1 + $0xe4] sm:$0xf0]  ;;  %v3279_v24 = vld [vmem:[%s5218_s1 + $0x54] sm:$0xf0] }
   0x7   :  { %673 = vmatpush.bf16.msra.mxu1 %v2389_v12  ;;  %v2381_v25 = vor.u32 %v3297_v22, %v2380_v20  ;;  %v2436_v26 = vld [vmem:[%s5218_s1 + $0x150] sm:$0xf]  ;;  %v3311_v27 = vld [vmem:[%s5218_s1 + $0x154] sm:$0xf0]  ;;  %v2309_v29 = vor.u32 %v3279_v24, %v2308_v23  ;;  %v2300_v35 = vld [vmem:[%s5218_s1 + $0x40] sm:$0xf] }
   0x8   :  { %v2500_v28 = vld [vmem:[%s5218_s1 + $0x1d0] sm:$0xf]  ;;  %660 = vmatpush.bf16.msra.mxu0 %v2317_v16  ;;  %v3327_v30 = vld [vmem:[%s5218_s1 + $0x1d4] sm:$0xf0]  ;;  %v2437_v33 = vor.u32 %v3311_v27, %v2436_v26  ;;  %v3277_v36 = vld [vmem:[%s5218_s1 + $0x44] sm:$0xf0] }
   0x9   :  { %v2372_v31 = vld [vmem:[%s5218_s1 + $0xd0] sm:$0xf]  ;;  %v3295_v32 = vld [vmem:[%s5218_s1 + $0xd4] sm:$0xf0]  ;;  %688 = vmatpush.bf16.msra.mxu2 %v2445_v17  ;;  %v2501_v34 = vor.u32 %v3327_v30, %v2500_v28  ;;  %v2428_v37 = vld [vmem:[%s5218_s1 + $0x140] sm:$0xf]  ;;  %v2301_v44 = vor.u32 %v3277_v36, %v2300_v35 }
   0xa   :  { %702 = vmatpush.bf16.msra.mxu3 %v2509_v21  ;;  %v2373_v38 = vor.u32 %v3295_v32, %v2372_v31  ;;  %v3309_v39 = vld [vmem:[%s5218_s1 + $0x144] sm:$0xf0]  ;;  %v2492_v40 = vld [vmem:[%s5218_s1 + $0x1c0] sm:$0xf]  ;;  %v2292_v47 = vld [vmem:[%s5218_s1 + $0x30] sm:$0xf] }
   0xb   :  { %674 = vmatpush.bf16.msra.mxu1 %v2381_v25  ;;  %v3325_v41 = vld [vmem:[%s5218_s1 + $0x1c4] sm:$0xf0]  ;;  %v2364_v42 = vld [vmem:[%s5218_s1 + $0xc0] sm:$0xf]  ;;  %v2429_v45 = vor.u32 %v3309_v39, %v2428_v37  ;;  %v3275_v48 = vld [vmem:[%s5218_s1 + $0x34] sm:$0xf0] }
   0xc   :  { %v3293_v43 = vld [vmem:[%s5218_s1 + $0xc4] sm:$0xf0]  ;;  %661 = vmatpush.bf16.msra.mxu0 %v2309_v29  ;;  %v2493_v46 = vor.u32 %v3325_v41, %v2492_v40  ;;  %v2420_v49 = vld [vmem:[%s5218_s1 + $0x130] sm:$0xf]  ;;  %v3307_v51 = vld [vmem:[%s5218_s1 + $0x134] sm:$0xf0]  ;;  %v2293_v56 = vor.u32 %v3275_v48, %v2292_v47 }
   0xd   :  { %689 = vmatpush.bf16.msra.mxu2 %v2437_v33  ;;  %v2365_v50 = vor.u32 %v3293_v43, %v2364_v42  ;;  %v2484_v52 = vld [vmem:[%s5218_s1 + $0x1b0] sm:$0xf]  ;;  %v3323_v53 = vld [vmem:[%s5218_s1 + $0x1b4] sm:$0xf0]  ;;  %v2421_v57 = vor.u32 %v3307_v51, %v2420_v49  ;;  %v2284_v59 = vld [vmem:[%s5218_s1 + $0x20] sm:$0xf] }
   0xe   :  { %703 = vmatpush.bf16.msra.mxu3 %v2501_v34  ;;  %v2356_v54 = vld [vmem:[%s5218_s1 + $0xb0] sm:$0xf]  ;;  %v3291_v55 = vld [vmem:[%s5218_s1 + $0xb4] sm:$0xf0]  ;;  %v2485_v58 = vor.u32 %v3323_v53, %v2484_v52  ;;  %v3273_v60 = vld [vmem:[%s5218_s1 + $0x24] sm:$0xf0] }
   0xf   :  { %675 = vmatpush.bf16.msra.mxu1 %v2373_v38  ;;  %v2412_v61 = vld [vmem:[%s5218_s1 + $0x120] sm:$0xf]  ;;  %v2357_v62 = vor.u32 %v3291_v55, %v2356_v54  ;;  %v3305_v63 = vld [vmem:[%s5218_s1 + $0x124] sm:$0xf0]  ;;  %v2285_v4 = vor.u32 %v3273_v60, %v2284_v59  ;;  %v2276_v5 = vld [vmem:[%s5218_s1 + $0x10] sm:$0xf] }
  0x10   :  { %662 = vmatpush.bf16.msra.mxu0 %v2301_v44  ;;  %v2476_v0 = vld [vmem:[%s5218_s1 + $0x1a0] sm:$0xf]  ;;  %v3321_v1 = vld [vmem:[%s5218_s1 + $0x1a4] sm:$0xf0]  ;;  %v2413_v6 = vor.u32 %v3305_v63, %v2412_v61  ;;  %v3271_v8 = vld [vmem:[%s5218_s1 + $0x14] sm:$0xf0] }
  0x11   :  { %690 = vmatpush.bf16.msra.mxu2 %v2429_v45  ;;  %v2348_v2 = vld [vmem:[%s5218_s1 + $0xa0] sm:$0xf]  ;;  %v3289_v3 = vld [vmem:[%s5218_s1 + $0xa4] sm:$0xf0]  ;;  %v2477_v7 = vor.u32 %v3321_v1, %v2476_v0  ;;  %v2404_v9 = vld [vmem:[%s5218_s1 + $0x110] sm:$0xf]  ;;  %v2277_v18 = vor.u32 %v3271_v8, %v2276_v5 }
  0x12   :  { %704 = vmatpush.bf16.msra.mxu3 %v2493_v46  ;;  %v3303_v10 = vld [vmem:[%s5218_s1 + $0x114] sm:$0xf0]  ;;  %v2349_v11 = vor.u32 %v3289_v3, %v2348_v2  ;;  %v2468_v12 = vld [vmem:[%s5218_s1 + $0x190] sm:$0xf]  ;;  %v2268_v16 = vld [vmem:[%s5218_s1] sm:$0xf] }
  0x13   :  { %676 = vmatpush.bf16.msra.mxu1 %v2365_v50  ;;  %v3319_v13 = vld [vmem:[%s5218_s1 + $0x194] sm:$0xf0]  ;;  %v2340_v14 = vld [vmem:[%s5218_s1 + $0x90] sm:$0xf]  ;;  %v3269_v17 = vld [vmem:[%s5218_s1 + $0x4] sm:$0xf0]  ;;  %v2405_v23 = vor.u32 %v3303_v10, %v2404_v9 }
  0x14   :  { %663 = vmatpush.bf16.msra.mxu0 %v2293_v56  ;;  %v3287_v15 = vld [vmem:[%s5218_s1 + $0x94] sm:$0xf0]  ;;  %v2396_v19 = vld [vmem:[%s5218_s1 + $0x100] sm:$0xf]  ;;  %v3301_v20 = vld [vmem:[%s5218_s1 + $0x104] sm:$0xf0]  ;;  %v2469_v24 = vor.u32 %v3319_v13, %v2468_v12  ;;  %v2269_v35 = vor.u32 %v3269_v17, %v2268_v16 }
  0x15   :  { %691 = vmatpush.bf16.msra.mxu2 %v2421_v57  ;;  %v2460_v21 = vld [vmem:[%s5218_s1 + $0x180] sm:$0xf]  ;;  %v3317_v22 = vld [vmem:[%s5218_s1 + $0x184] sm:$0xf0]  ;;  %v2580_v25 = vld [vmem:[%s5218_s1 + $0x270] sm:$0xf]  ;;  %v2341_v28 = vor.u32 %v3287_v15, %v2340_v14  ;;  %v2397_v39 = vor.u32 %v3301_v20, %v2396_v19 }
  0x16   :  { %705 = vmatpush.bf16.msra.mxu3 %v2485_v58  ;;  %v3347_v26 = vld [vmem:[%s5218_s1 + $0x274] sm:$0xf0]  ;;  %v3282_v27 = vld [vmem:[%s5218_s1 + $0x74] sm:$0xf]  ;;  %v2326_v29 = vld [vmem:[%s5218_s1 + $0x78] sm:$0xf0]  ;;  %v2461_v40 = vor.u32 %v3317_v22, %v2460_v21 }
  0x17   :  { %677 = vmatpush.bf16.msra.mxu1 %v2357_v62  ;;  %v2332_v30 = vld [vmem:[%s5218_s1 + $0x80] sm:$0xf]  ;;  %v3285_v31 = vld [vmem:[%s5218_s1 + $0x84] sm:$0xf0]  ;;  %v42_v32 = vld [vmem:[%s5217_s0 + $0x10] sm:$0xff]  ;;  %v2581_v44 = vor.u32 %v3347_v26, %v2580_v25  ;;  %v2329_v45 = vor.u32 %v3282_v27, %v2326_v29 }
  0x18   :  { %664 = vmatpush.bf16.msra.mxu0 %v2285_v4  ;;  %v49_v33 = vld [vmem:[%s5217_s0 + $0x48] sm:$0xff]  ;;  %v2644_v34 = vld [vmem:[%s5218_s1 + $0x2f0] sm:$0xf]  ;;  %v3363_v36 = vld [vmem:[%s5218_s1 + $0x2f4] sm:$0xf0]  ;;  %v2333_v49 = vor.u32 %v3285_v31, %v2332_v30 }
  0x19   :  { %692 = vmatpush.bf16.msra.mxu2 %v2413_v6  ;;  %v2652_v37 = vld [vmem:[%s5218_s1 + $0x300] sm:$0xf]  ;;  %v3365_v38 = vld [vmem:[%s5218_s1 + $0x304] sm:$0xf0]  ;;  %v3298_v41 = vld [vmem:[%s5218_s1 + $0xf4] sm:$0xf]  ;;  %v3917_v54 = vpack.c.bf16 %v49_v33, %v42_v32  ;;  %v2645_v55 = vor.u32 %v3363_v36, %v2644_v34 }
  0x1a   :  { %706 = vmatpush.bf16.msra.mxu3 %v2477_v7  ;;  %v2390_v42 = vld [vmem:[%s5218_s1 + $0xf8] sm:$0xf0]  ;;  %v40_v43 = vld [vmem:[%s5217_s0] sm:$0xff]  ;;  %v50_v48 = vld [vmem:[%s5217_s0 + $0x50] sm:$0xff]  ;;  %v2653_v50 = vor.u32 %v3365_v38, %v2652_v37 }
  0x1b   :  { %678 = vmatpush.bf16.msra.mxu1 %v2349_v11  ;;  %v47_v46 = vld [vmem:[%s5217_s0 + $0x38] sm:$0xff]  ;;  %v2572_v51 = vld [vmem:[%s5218_s1 + $0x260] sm:$0xf]  ;;  %v3345_v52 = vld [vmem:[%s5218_s1 + $0x264] sm:$0xf0]  ;;  %v2393_v59 = vor.u32 %v3298_v41, %v2390_v42 }
  0x1c   :  { %665 = vmatpush.bf16.msra.mxu0 %v2277_v18  ;;  %v43_v47 = vld [vmem:[%s5217_s0 + $0x18] sm:$0xff]  ;;  %v3280_v53 = vld [vmem:[%s5218_s1 + $0x64] sm:$0xf]  ;;  %v2318_v56 = vld [vmem:[%s5218_s1 + $0x68] sm:$0xf0]  ;;  %v3928_v60 = vpack.c.bf16 %v47_v46, %v40_v43  ;;  %v2573_v0 = vor.u32 %v3345_v52, %v2572_v51 }
  0x1d   :  { %693 = vmatpush.bf16.msra.mxu2 %v2405_v23  ;;  %v41_v57 = vld [vmem:[%s5217_s0 + $0x8] sm:$0xff]  ;;  %v48_v58 = vld [vmem:[%s5217_s0 + $0x40] sm:$0xff]  ;;  %v3936_v63 = vpack.c.bf16 %v50_v48, %v43_v47  ;;  %v2321_v3 = vor.u32 %v3280_v53, %v2318_v56  ;;  %v2564_v5 = vld [vmem:[%s5218_s1 + $0x250] sm:$0xf] }
  0x1e   :  { %707 = vmatpush.bf16.msra.mxu3 %v2469_v24  ;;  %v2636_v61 = vld [vmem:[%s5218_s1 + $0x2e0] sm:$0xf]  ;;  %v3361_v62 = vld [vmem:[%s5218_s1 + $0x2e4] sm:$0xf0]  ;;  %v3296_v1 = vld [vmem:[%s5218_s1 + $0xe4] sm:$0xf]  ;;  %v3944_v4 = vpack.c.bf16 %v48_v58, %v41_v57 }
  0x1f   :  { %679 = vmatpush.bf16.msra.mxu1 %v2341_v28  ;;  %v2382_v2 = vld [vmem:[%s5218_s1 + $0xe8] sm:$0xf0]  ;;  %v3343_v6 = vld [vmem:[%s5218_s1 + $0x254] sm:$0xf0]  ;;  %v2637_v7 = vor.u32 %v3361_v62, %v2636_v61  ;;  %v3278_v8 = vld [vmem:[%s5218_s1 + $0x54] sm:$0xf] }
  0x20   :  { %666 = vmatpush.bf16.msra.mxu0 %v2269_v35  ;;  %v2310_v9 = vld [vmem:[%s5218_s1 + $0x58] sm:$0xf0]  ;;  %v2385_v10 = vor.u32 %v3296_v1, %v2382_v2  ;;  %v2628_v11 = vld [vmem:[%s5218_s1 + $0x2d0] sm:$0xf]  ;;  %v3359_v12 = vld [vmem:[%s5218_s1 + $0x2d4] sm:$0xf0]  ;;  %v2565_v13 = vor.u32 %v3343_v6, %v2564_v5 }
  0x21   :  { %694 = vmatpush.bf16.msra.mxu2 %v2397_v39  ;;  %v3294_v14 = vld [vmem:[%s5218_s1 + $0xd4] sm:$0xf]  ;;  %v2374_v15 = vld [vmem:[%s5218_s1 + $0xd8] sm:$0xf0]  ;;  %v2313_v16 = vor.u32 %v3278_v8, %v2310_v9  ;;  %v2556_v17 = vld [vmem:[%s5218_s1 + $0x240] sm:$0xf]  ;;  %v2629_v19 = vor.u32 %v3359_v12, %v2628_v11 }
  0x22   :  { %708 = vmatpush.bf16.msra.mxu3 %v2461_v40  ;;  %v3341_v18 = vld [vmem:[%s5218_s1 + $0x244] sm:$0xf0]  ;;  %v3276_v20 = vld [vmem:[%s5218_s1 + $0x44] sm:$0xf]  ;;  %v2302_v21 = vld [vmem:[%s5218_s1 + $0x48] sm:$0xf0]  ;;  %v2377_v22 = vor.u32 %v3294_v14, %v2374_v15 }
  0x23   :  { %680 = vmatpush.bf16.msra.mxu1 %v2333_v49  ;;  %667 = vmatmul.bf16.vlgmr.msra.gmra.mxu0 %v3928_v60  ;;  %v2620_v23 = vld [vmem:[%s5218_s1 + $0x2c0] sm:$0xf]  ;;  %v3357_v24 = vld [vmem:[%s5218_s1 + $0x2c4] sm:$0xf0]  ;;  %v2557_v25 = vor.u32 %v3341_v18, %v2556_v17  ;;  %v3292_v26 = vld [vmem:[%s5218_s1 + $0xc4] sm:$0xf]  ;;  %v2305_v28 = vor.u32 %v3276_v20, %v2302_v21 }
  0x24   :  { %715 = vmatpush.bf16.msrb.mxu0 %v2581_v44  ;;  %695 = vmatmul.bf16.vlgmr.msra.gmra.mxu2 %v3917_v54  ;;  %v2366_v27 = vld [vmem:[%s5218_s1 + $0xc8] sm:$0xf0]  ;;  %v2548_v29 = vld [vmem:[%s5218_s1 + $0x230] sm:$0xf]  ;;  %v3339_v30 = vld [vmem:[%s5218_s1 + $0x234] sm:$0xf0]  ;;  %v2621_v31 = vor.u32 %v3357_v24, %v2620_v23 }
  0x25   :  { %750 = vmatpush.bf16.msrb.mxu2 %v2653_v50  ;;  %709 = vmatmul.bf16.vlgmr.msra.gmra.mxu3 %v3936_v63  ;;  %v3274_v32 = vld [vmem:[%s5218_s1 + $0x34] sm:$0xf]  ;;  %v2294_v33 = vld [vmem:[%s5218_s1 + $0x38] sm:$0xf0]  ;;  %v2612_v34 = vld [vmem:[%s5218_s1 + $0x2b0] sm:$0xf]  ;;  %v2369_v35 = vor.u32 %v3292_v26, %v2366_v27  ;;  %v2549_v39 = vor.u32 %v3339_v30, %v2548_v29 }
  0x26   :  { %757 = vmatpush.bf16.msrb.mxu3 %v2329_v45  ;;  %681 = vmatmul.bf16.vlgmr.msra.gmra.mxu1 %v3944_v4  ;;  %v3355_v36 = vld [vmem:[%s5218_s1 + $0x2b4] sm:$0xf0]  ;;  %v46_v37 = vld [vmem:[%s5217_s0 + $0x30] sm:$0xff]  ;;  %v53_v38 = vld [vmem:[%s5217_s0 + $0x68] sm:$0xff]  ;;  %v2297_v42 = vor.u32 %v3274_v32, %v2294_v33 }
  0x27   :  { %729 = vmatpush.bf16.msrb.mxu1 %v2645_v55  ;;  %v3290_v40 = vld [vmem:[%s5218_s1 + $0xb4] sm:$0xf]  ;;  %v2358_v41 = vld [vmem:[%s5218_s1 + $0xb8] sm:$0xf0]  ;;  %v2540_v43 = vld [vmem:[%s5218_s1 + $0x220] sm:$0xf]  ;;  %v2613_v45 = vor.u32 %v3355_v36, %v2612_v34  ;;  %v4040_v48 = vpack.c.bf16 %v53_v38, %v46_v37 }
  0x28   :  { %716 = vmatpush.bf16.msrb.mxu0 %v2573_v0  ;;  %v3337_v44 = vld [vmem:[%s5218_s1 + $0x224] sm:$0xf0]  ;;  %v3272_v46 = vld [vmem:[%s5218_s1 + $0x24] sm:$0xf]  ;;  %v2286_v47 = vld [vmem:[%s5218_s1 + $0x28] sm:$0xf0]  ;;  %v2361_v49 = vor.u32 %v3290_v40, %v2358_v41 }
  0x29   :  { %771 = vmatpush.bf16.msra.mxu2 %v2393_v59  ;;  %v2604_v50 = vld [vmem:[%s5218_s1 + $0x2a0] sm:$0xf]  ;;  %v3353_v51 = vld [vmem:[%s5218_s1 + $0x2a4] sm:$0xf0]  ;;  %v2541_v52 = vor.u32 %v3337_v44, %v2540_v43  ;;  %v3288_v53 = vld [vmem:[%s5218_s1 + $0xa4] sm:$0xf]  ;;  %v2289_v56 = vor.u32 %v3272_v46, %v2286_v47 }
  0x2a   :  { %758 = vmatpush.bf16.msrb.mxu3 %v2321_v3  ;;  %v2350_v55 = vld [vmem:[%s5218_s1 + $0xa8] sm:$0xf0]  ;;  %v2532_v57 = vld [vmem:[%s5218_s1 + $0x210] sm:$0xf]  ;;  %v3335_v58 = vld [vmem:[%s5218_s1 + $0x214] sm:$0xf0]  ;;  %v2605_v61 = vor.u32 %v3353_v51, %v2604_v50 }
  0x2b   :  { %730 = vmatpush.bf16.msrb.mxu1 %v2637_v7  ;;  %v3270_v59 = vld [vmem:[%s5218_s1 + $0x14] sm:$0xf]  ;;  %v2278_v62 = vld [vmem:[%s5218_s1 + $0x18] sm:$0xf0]  ;;  %v2596_v0 = vld [vmem:[%s5218_s1 + $0x290] sm:$0xf]  ;;  %v2353_v2 = vor.u32 %v3288_v53, %v2350_v55  ;;  %v2533_v7 = vor.u32 %v3335_v58, %v2532_v57 }
  0x2c   :  { %717 = vmatpush.bf16.msrb.mxu0 %v2565_v13  ;;  %v3351_v1 = vld [vmem:[%s5218_s1 + $0x294] sm:$0xf0]  ;;  %v3286_v3 = vld [vmem:[%s5218_s1 + $0x94] sm:$0xf]  ;;  %v2342_v5 = vld [vmem:[%s5218_s1 + $0x98] sm:$0xf0]  ;;  %v2281_v11 = vor.u32 %v3270_v59, %v2278_v62 }
  0x2d   :  { %772 = vmatpush.bf16.msra.mxu2 %v2385_v10  ;;  %v2524_v6 = vld [vmem:[%s5218_s1 + $0x200] sm:$0xf]  ;;  %v3333_v8 = vld [vmem:[%s5218_s1 + $0x204] sm:$0xf0]  ;;  %v3268_v9 = vld [vmem:[%s5218_s1 + $0x4] sm:$0xf]  ;;  %v2597_v15 = vor.u32 %v3351_v1, %v2596_v0 }
  0x2e   :  { %759 = vmatpush.bf16.msrb.mxu3 %v2313_v16  ;;  %v2270_v10 = vld [vmem:[%s5218_s1 + $0x8] sm:$0xf0]  ;;  %v3314_v12 = vld [vmem:[%s5218_s1 + $0x174] sm:$0xf]  ;;  %v2454_v13 = vld [vmem:[%s5218_s1 + $0x178] sm:$0xf0]  ;;  %v2525_v23 = vor.u32 %v3333_v8, %v2524_v6 }
  0x2f   :  { %731 = vmatpush.bf16.msrb.mxu1 %v2629_v19  ;;  %v3346_v14 = vld [vmem:[%s5218_s1 + $0x274] sm:$0xf]  ;;  %v2582_v16 = vld [vmem:[%s5218_s1 + $0x278] sm:$0xf0]  ;;  %v2588_v17 = vld [vmem:[%s5218_s1 + $0x280] sm:$0xf]  ;;  %v2345_v19 = vor.u32 %v3286_v3, %v2342_v5  ;;  %v2273_v27 = vor.u32 %v3268_v9, %v2270_v10 }
  0x30   :  { %718 = vmatpush.bf16.msrb.mxu0 %v2557_v25  ;;  %v3349_v18 = vld [vmem:[%s5218_s1 + $0x284] sm:$0xf0]  ;;  %v44_v20 = vld [vmem:[%s5217_s0 + $0x20] sm:$0xff]  ;;  %v51_v21 = vld [vmem:[%s5217_s0 + $0x58] sm:$0xff]  ;;  %v2585_v32 = vor.u32 %v3346_v14, %v2582_v16 }
  0x31   :  { %773 = vmatpush.bf16.msra.mxu2 %v2377_v22  ;;  %v3284_v22 = vld [vmem:[%s5218_s1 + $0x84] sm:$0xf]  ;;  %v2334_v24 = vld [vmem:[%s5218_s1 + $0x88] sm:$0xf0]  ;;  %v3330_v25 = vld [vmem:[%s5218_s1 + $0x1f4] sm:$0xf]  ;;  %v2589_v33 = vor.u32 %v3349_v18, %v2588_v17  ;;  %v4146_v37 = vpack.c.bf16 %v51_v21, %v44_v20 }
  0x32   :  { %760 = vmatpush.bf16.msrb.mxu3 %v2305_v28  ;;  %v2518_v26 = vld [vmem:[%s5218_s1 + $0x1f8] sm:$0xf0]  ;;  %v2457_v28 = vor.u32 %v3314_v12, %v2454_v13  ;;  %v3362_v29 = vld [vmem:[%s5218_s1 + $0x2f4] sm:$0xf]  ;;  %v52_v34 = vld [vmem:[%s5217_s0 + $0x60] sm:$0xff]  ;;  %v2337_v38 = vor.u32 %v3284_v22, %v2334_v24 }
  0x33   :  { %732 = vmatpush.bf16.msrb.mxu1 %v2621_v31  ;;  %v2646_v30 = vld [vmem:[%s5218_s1 + $0x2f8] sm:$0xf0]  ;;  %v45_v31 = vld [vmem:[%s5217_s0 + $0x28] sm:$0xff]  ;;  %v2521_v41 = vor.u32 %v3330_v25, %v2518_v26  ;;  %v3328_v43 = vld [vmem:[%s5218_s1 + $0x1e4] sm:$0xf] }
  0x34   :  { %719 = vmatpush.bf16.msrb.mxu0 %v2549_v39  ;;  %2658 = vmatmul.msk.bf16.vlgmr.msrb.gmra.mxu2 %vm655_vm0, %v4040_v48  ;;  %v2446_v36 = vld [vmem:[%s5218_s1 + $0x168] sm:$0xf0]  ;;  %v3344_v39 = vld [vmem:[%s5218_s1 + $0x264] sm:$0xf]  ;;  %v4157_v44 = vpack.c.bf16 %v52_v34, %v45_v31  ;;  %v3310_v51 = vld [vmem:[%s5218_s1 + $0x154] sm:$0xf] }
  0x35   :  { %774 = vmatpush.bf16.msra.mxu2 %v2369_v35  ;;  %v3312_v35 = vld [vmem:[%s5218_s1 + $0x164] sm:$0xf]  ;;  %v2574_v40 = vld [vmem:[%s5218_s1 + $0x268] sm:$0xf0]  ;;  %v3342_v53 = vld [vmem:[%s5218_s1 + $0x254] sm:$0xf] }
  0x36   :  { %761 = vmatpush.bf16.msrb.mxu3 %v2297_v42  ;;  %v2649_v42 = vor.u32 %v3362_v29, %v2646_v30  ;;  %v2510_v46 = vld [vmem:[%s5218_s1 + $0x1e8] sm:$0xf0]  ;;  %v3360_v47 = vld [vmem:[%s5218_s1 + $0x2e4] sm:$0xf]  ;;  %v2577_v50 = vor.u32 %v3344_v39, %v2574_v40  ;;  %v2566_v55 = vld [vmem:[%s5218_s1 + $0x258] sm:$0xf0] }
  0x37   :  { %733 = vmatpush.bf16.msrb.mxu1 %v2613_v45  ;;  %v2449_v45 = vor.u32 %v3312_v35, %v2446_v36  ;;  %v3326_v58 = vld [vmem:[%s5218_s1 + $0x1d4] sm:$0xf]  ;;  %v2630_v0 = vld [vmem:[%s5218_s1 + $0x2d8] sm:$0xf0]  ;;  %v2569_v1 = vor.u32 %v3342_v53, %v2566_v55  ;;  %v2430_v3 = vld [vmem:[%s5218_s1 + $0x148] sm:$0xf0] }
  0x38   :  { %720 = vmatpush.bf16.msrb.mxu0 %v2541_v52  ;;  %v2438_v52 = vld [vmem:[%s5218_s1 + $0x158] sm:$0xf0]  ;;  %v3358_v62 = vld [vmem:[%s5218_s1 + $0x2d4] sm:$0xf]  ;;  %v3340_v5 = vld [vmem:[%s5218_s1 + $0x244] sm:$0xf] }
  0x39   :  { %775 = vmatpush.bf16.msra.mxu2 %v2361_v49  ;;  %v2638_v49 = vld [vmem:[%s5218_s1 + $0x2e8] sm:$0xf0]  ;;  %v2441_v59 = vor.u32 %v3310_v51, %v2438_v52  ;;  %v2633_v8 = vor.u32 %v3358_v62, %v2630_v0  ;;  %v3356_v9 = vld [vmem:[%s5218_s1 + $0x2c4] sm:$0xf] }
  0x3a   :  { %762 = vmatpush.bf16.msrb.mxu3 %v2289_v56  ;;  %v2513_v56 = vor.u32 %v3328_v43, %v2510_v46  ;;  %v2641_v57 = vor.u32 %v3360_v47, %v2638_v49  ;;  %v2558_v6 = vld [vmem:[%s5218_s1 + $0x248] sm:$0xf0] }
  0x3b   :  { %734 = vmatpush.bf16.msrb.mxu1 %v2605_v61  ;;  %v2502_v61 = vld [vmem:[%s5218_s1 + $0x1d8] sm:$0xf0]  ;;  %v2622_v10 = vld [vmem:[%s5218_s1 + $0x2c8] sm:$0xf0] }
  0x3c   :  { %721 = vmatpush.bf16.msrb.mxu0 %v2533_v7  ;;  %v2505_v7 = vor.u32 %v3326_v58, %v2502_v61 }
  0x3d   :  { %776 = vmatpush.bf16.msra.mxu2 %v2353_v2  ;;  %v3308_v2 = vld [vmem:[%s5218_s1 + $0x144] sm:$0xf] }
  0x3e   :  { %763 = vmatpush.bf16.msrb.mxu3 %v2281_v11  ;;  %v2433_v11 = vor.u32 %v3308_v2, %v2430_v3 }
  0x3f   :  { %735 = vmatpush.bf16.msrb.mxu1 %v2597_v15 }
  0x40   :  { %722 = vmatpush.bf16.msrb.mxu0 %v2525_v23 }
  0x41   :  { %777 = vmatpush.bf16.msra.mxu2 %v2345_v19 }
  0x42   :  { %764 = vmatpush.bf16.msrb.mxu3 %v2273_v27 }
  0x43   :  { %736 = vmatpush.bf16.msrb.mxu1 %v2589_v33  ;;  %723 = vmatmul.bf16.vlgmr.msrb.gmra.mxu0 %v4146_v37 }
  0x44   :  { %785 = vmatpush.bf16.msra.mxu0 %v2457_v28 }
  0x45   :  { %778 = vmatpush.bf16.msra.mxu2 %v2337_v38  ;;  %765 = vmatmul.bf16.vlgmr.msrb.gmra.mxu3 %v3928_v60  ;;  %v2494_v60 = vld [vmem:[%s5218_s1 + $0x1c8] sm:$0xf0] }
  0x46   :  { %813 = vmatpush.bf16.msra.mxu3 %v2585_v32  ;;  %737 = vmatmul.bf16.vlgmr.msrb.gmra.mxu1 %v4157_v44 }
  0x47   :  { %799 = vmatpush.bf16.msra.mxu1 %v2521_v41 }
  0x48   :  { %786 = vmatpush.bf16.msra.mxu0 %v2449_v45  ;;  %779 = vmatmul.bf16.vlgmr.msra.gmra.mxu2 %v3944_v4  ;;  %v3324_v4 = vld [vmem:[%s5218_s1 + $0x1c4] sm:$0xf] }
  0x49   :  { %827 = vmatpush.bf16.msrb.mxu2 %v2649_v42 }
  0x4a   :  { %814 = vmatpush.bf16.msra.mxu3 %v2577_v50 }
  0x4b   :  { %800 = vmatpush.bf16.msra.mxu1 %v2513_v56 }
  0x4c   :  { %787 = vmatpush.bf16.msra.mxu0 %v2441_v59 }
  0x4d   :  { %828 = vmatpush.bf16.msrb.mxu2 %v2641_v57 }
  0x4e   :  { %16 = vsyncpa [#allocation3], 0  ;;  %815 = vmatpush.bf16.msra.mxu3 %v2569_v1  ;;  %v2561_v12 = vor.u32 %v3340_v5, %v2558_v6  ;;  %v3306_v13 = vld [vmem:[%s5218_s1 + $0x134] sm:$0xf]  ;;  %v2422_v14 = vld [vmem:[%s5218_s1 + $0x138] sm:$0xf0]  ;;  %v2497_v17 = vor.u32 %v3324_v4, %v2494_v60  ;;  %v2625_v18 = vor.u32 %v3356_v9, %v2622_v10 }
  0x4f   :  { %v3338_v15 = vld [vmem:[%s5218_s1 + $0x234] sm:$0xf]  ;;  %v2550_v16 = vld [vmem:[%s5218_s1 + $0x238] sm:$0xf0]  ;;  %801 = vmatpush.bf16.msra.mxu1 %v2505_v7  ;;  %v2425_v20 = vor.u32 %v3306_v13, %v2422_v14  ;;  %v3304_v25 = vld [vmem:[%s5218_s1 + $0x124] sm:$0xf] }
  0x50   :  { %v3322_v19 = vld [vmem:[%s5218_s1 + $0x1b4] sm:$0xf]  ;;  %788 = vmatpush.bf16.msra.mxu0 %v2433_v11  ;;  %v2486_v21 = vld [vmem:[%s5218_s1 + $0x1b8] sm:$0xf0]  ;;  %v2553_v24 = vor.u32 %v3338_v15, %v2550_v16  ;;  %v2414_v26 = vld [vmem:[%s5218_s1 + $0x128] sm:$0xf0] }
  0x51   :  { %829 = vmatpush.bf16.msrb.mxu2 %v2633_v8  ;;  %v3354_v22 = vld [vmem:[%s5218_s1 + $0x2b4] sm:$0xf]  ;;  %v2614_v23 = vld [vmem:[%s5218_s1 + $0x2b8] sm:$0xf0]  ;;  %v3336_v27 = vld [vmem:[%s5218_s1 + $0x224] sm:$0xf]  ;;  %v2489_v29 = vor.u32 %v3322_v19, %v2486_v21  ;;  %v2417_v32 = vor.u32 %v3304_v25, %v2414_v26 }
  0x52   :  { %816 = vmatpush.bf16.msra.mxu3 %v2561_v12  ;;  %v2542_v28 = vld [vmem:[%s5218_s1 + $0x228] sm:$0xf0]  ;;  %v2617_v30 = vor.u32 %v3354_v22, %v2614_v23  ;;  %v3320_v31 = vld [vmem:[%s5218_s1 + $0x1a4] sm:$0xf]  ;;  %v3302_v38 = vld [vmem:[%s5218_s1 + $0x114] sm:$0xf] }
  0x53   :  { %802 = vmatpush.bf16.msra.mxu1 %v2497_v17  ;;  %v2478_v33 = vld [vmem:[%s5218_s1 + $0x1a8] sm:$0xf0]  ;;  %v3352_v34 = vld [vmem:[%s5218_s1 + $0x2a4] sm:$0xf]  ;;  %v2545_v36 = vor.u32 %v3336_v27, %v2542_v28  ;;  %v2406_v39 = vld [vmem:[%s5218_s1 + $0x118] sm:$0xf0] }
  0x54   :  { %789 = vmatpush.bf16.msra.mxu0 %v2425_v20  ;;  %v2606_v35 = vld [vmem:[%s5218_s1 + $0x2a8] sm:$0xf0]  ;;  %v3334_v40 = vld [vmem:[%s5218_s1 + $0x214] sm:$0xf]  ;;  %v2534_v41 = vld [vmem:[%s5218_s1 + $0x218] sm:$0xf0]  ;;  %v2481_v42 = vor.u32 %v3320_v31, %v2478_v33  ;;  %v2409_v46 = vor.u32 %v3302_v38, %v2406_v39 }
  0x55   :  { %830 = vmatpush.bf16.msrb.mxu2 %v2625_v18  ;;  %v2609_v43 = vor.u32 %v3352_v34, %v2606_v35  ;;  %v3318_v45 = vld [vmem:[%s5218_s1 + $0x194] sm:$0xf]  ;;  %v2470_v47 = vld [vmem:[%s5218_s1 + $0x198] sm:$0xf0]  ;;  %v2537_v51 = vor.u32 %v3334_v40, %v2534_v41  ;;  %v3300_v52 = vld [vmem:[%s5218_s1 + $0x104] sm:$0xf] }
  0x56   :  { %817 = vmatpush.bf16.msra.mxu3 %v2553_v24  ;;  %v3350_v49 = vld [vmem:[%s5218_s1 + $0x294] sm:$0xf]  ;;  %v2598_v50 = vld [vmem:[%s5218_s1 + $0x298] sm:$0xf0]  ;;  %v2398_v53 = vld [vmem:[%s5218_s1 + $0x108] sm:$0xf0]  ;;  %v2473_v57 = vor.u32 %v3318_v45, %v2470_v47 }
  0x57   :  { %803 = vmatpush.bf16.msra.mxu1 %v2489_v29  ;;  %v3332_v55 = vld [vmem:[%s5218_s1 + $0x204] sm:$0xf]  ;;  %v2526_v56 = vld [vmem:[%s5218_s1 + $0x208] sm:$0xf0]  ;;  %v2601_v58 = vor.u32 %v3350_v49, %v2598_v50  ;;  %v2401_v59 = vor.u32 %v3300_v52, %v2398_v53  ;;  %v3373_v8 = vld [vmem:[%s5220_s3 + $0x38] sm:$0xff]  ;;  %vm2242_vm1 = vcmask 125952  }
  0x58   :  { %790 = vmatpush.bf16.msra.mxu0 %v2417_v32  ;;  %v3316_v61 = vld [vmem:[%s5218_s1 + $0x184] sm:$0xf]  ;;  %v2462_v62 = vld [vmem:[%s5218_s1 + $0x188] sm:$0xf0]  ;;  %v2529_v0 = vor.u32 %v3332_v55, %v2526_v56  ;;  %v4352_v9 = vld [vmem:[%s5219_s2] sm:$0x3] }
  0x59   :  { %831 = vmatpush.bf16.msrb.mxu2 %v2617_v30  ;;  %v3348_v1 = vld [vmem:[%s5218_s1 + $0x284] sm:$0xf]  ;;  %v2590_v2 = vld [vmem:[%s5218_s1 + $0x288] sm:$0xf0]  ;;  %v2465_v6 = vor.u32 %v3316_v61, %v2462_v62  ;;  %v161_v14 = vperm.slane %v4352_v9, 0  ;;  %v3381_v31 = vld [vmem:[%s5220_s3 + $0x78] sm:$0xff] }
  0x5a   :  { %818 = vmatpush.bf16.msra.mxu3 %v2545_v36  ;;  %v3364_v3 = vld [vmem:[%s5218_s1 + $0x304] sm:$0xf]  ;;  %v2654_v5 = vld [vmem:[%s5218_s1 + $0x308] sm:$0xf0]  ;;  %v2593_v4 = vor.u32 %v3348_v1, %v2590_v2  ;;  %v3380_v36 = vld [vmem:[%s5220_s3 + $0x70] sm:$0xff]  ;;  %v162_v62 = vperm.slane %v4352_v9, 1 }
  0x5b   :  { %804 = vmatpush.bf16.msra.mxu1 %v2481_v42  ;;  %v2657_v7 = vor.u32 %v3364_v3, %v2654_v5  ;;  %v3367_v60 = vld [vmem:[%s5220_s3 + $0x8] sm:$0xff]  ;;  %v3366_v12 = vld [vmem:[%s5220_s3] sm:$0xff]  ;;  %v3376_v52 = vld [vmem:[%s5220_s3 + $0x50] sm:$0xff]  ;;  %s2254_s25 = sshll.u32 %s5228_s11, 4  ;;  %s3606_s26 = smov 448   ;;  %s2255_s25 = int_to_ptr.hbm [resolvable:$true] %s2254_s25 }
  0x5c   :  { %791 = vmatpush.bf16.msra.mxu0 %v2409_v46  ;;  %v3378_v47 = vld [vmem:[%s5220_s3 + $0x60] sm:$0xff]  ;;  %v3375_v55 = vld [vmem:[%s5220_s3 + $0x48] sm:$0xff]  ;;  %s3607_s27 = smov 28  }
  0x5d   :  { %832 = vmatpush.bf16.msrb.mxu2 %v2609_v43  ;;  %v3379_v43 = vld [vmem:[%s5220_s3 + $0x68] sm:$0xff] }
  0x5e   :  { %819 = vmatpush.bf16.msra.mxu3 %v2537_v51  ;;  %v3377_v51 = vld [vmem:[%s5220_s3 + $0x58] sm:$0xff] }
  0x5f   :  { %805 = vmatpush.bf16.msra.mxu1 %v2473_v57  ;;  %v3374_v57 = vld [vmem:[%s5220_s3 + $0x40] sm:$0xff] }
  0x60   :  { %792 = vmatpush.bf16.msra.mxu0 %v2401_v59 }
  0x61   :  { %833 = vmatpush.bf16.msrb.mxu2 %v2601_v58 }
  0x62   :  { %820 = vmatpush.bf16.msra.mxu3 %v2529_v0 }
  0x63   :  { %806 = vmatpush.bf16.msra.mxu1 %v2465_v6  ;;  %793 = vmatmul.bf16.vlgmr.msra.gmra.mxu0 %v3917_v54  ;;  %v3372_v54 = vld [vmem:[%s5220_s3 + $0x30] sm:$0xff] }
  0x65   :  { %821 = vmatmul.bf16.vlgmr.msra.gmra.mxu3 %v4146_v37  ;;  %834 = vmatpush.bf16.msrb.mxu2 %v2593_v4  ;;  %v3371_v37 = vld [vmem:[%s5220_s3 + $0x28] sm:$0xff] }
  0x66   :  { %807 = vmatmul.bf16.vlgmr.msra.gmra.mxu1 %v3936_v63  ;;  %v3370_v63 = vld [vmem:[%s5220_s3 + $0x20] sm:$0xff]  ;;  %1007 = vmatpush.bf16.msrb.mxu3 %v3381_v31  ;;  %v2816_v31 = vld [vmem:[%s5224_s7 + $0x78] sm:$0xf0] }
  0x67   :  { %993 = vmatpush.bf16.msrb.mxu1 %v3373_v8 }
  0x68   :  { %835 = vmatmul.bf16.vlgmr.msrb.gmra.mxu2 %v4157_v44  ;;  %v3368_v44 = vld [vmem:[%s5220_s3 + $0x10] sm:$0xff] }
  0x69   :  { %848 = vmatpush.bf16.msra.mxu2 %v2657_v7 }
  0x6a   :  { %1008 = vmatpush.bf16.msrb.mxu3 %v3380_v36  ;;  %v2808_v36 = vld [vmem:[%s5224_s7 + $0x68] sm:$0xf0] }
  0x6b   :  { %994 = vmatpush.bf16.msrb.mxu1 %v3372_v54 }
  0x6e   :  { %1009 = vmatpush.bf16.msrb.mxu3 %v3379_v43  ;;  %v2800_v43 = vld [vmem:[%s5224_s7 + $0x58] sm:$0xf0] }
  0x6f   :  { %995 = vmatpush.bf16.msrb.mxu1 %v3371_v37 }
  0x72   :  { %1010 = vmatpush.bf16.msrb.mxu3 %v3378_v47  ;;  %v2790_v47 = vld [vmem:[%s5224_s7 + $0x40] sm:$0xf] }
  0x73   :  { %996 = vmatpush.bf16.msrb.mxu1 %v3370_v63 }
  0x76   :  { %1011 = vmatpush.bf16.msrb.mxu3 %v3377_v51  ;;  %v2792_v51 = vld [vmem:[%s5224_s7 + $0x48] sm:$0xf0] }
  0x78   :  { %2659 = vmatmul.msk.bf16.vlgmr.msra.gmra.mxu2 %vm655_vm0, %v4040_v48  ;;  %v3369_v48 = vld [vmem:[%s5220_s3 + $0x18] sm:$0xff] }
  0x79   :  { %997 = vmatpush.bf16.msrb.mxu1 %v3369_v48 }
  0x7a   :  { %1012 = vmatpush.bf16.msrb.mxu3 %v3376_v52 }
  0x7d   :  { %998 = vmatpush.bf16.msrb.mxu1 %v3368_v44 }
  0x7e   :  { %1013 = vmatpush.bf16.msrb.mxu3 %v3375_v55 }
  0x81   :  { %999 = vmatpush.bf16.msrb.mxu1 %v3367_v60 }
  0x82   :  { %1014 = vmatpush.bf16.msrb.mxu3 %v3374_v57  ;;  %v3521_v57 = vld [vmem:[%s5221_s4] ss:$0 sm:$0xff] }
  0x85   :  { %1000 = vmatpush.bf16.msrb.mxu1 %v3366_v12 }
  0xa0   :  { %v668_v10 = vpop.f32.mrf.mxu0 }
  0xa1   :  { %v669_v15 = vadd.f32 %v668_v10, %v161_v14 }
  0xa3   :  { %v682_v13 = vpop.f32.mrf.mxu1 }
  0xa4   :  { %v683_v17 = vadd.f32 %v682_v13, %v669_v15 }
  0xa7   :  { %v696_v11 = vpop.f32.mrf.mxu2 }
  0xa8   :  { %v670_v16 = vpop.f32.mrf.mxu0  ;;  %v710_v19 = vpop.f32.mrf.mxu3  ;;  %v697_v22 = vadd.f32 %v696_v11, %v683_v17 }
  0xa9   :  { %v671_v21 = vadd.f32 %v670_v16, %v161_v14 }
  0xaa   :  { %v711_v25 = vadd.f32 %v710_v19, %v697_v22  ;;  %v3389_v19 = vld [vmem:[%s5222_s5 + $0x38] sm:$0xff]  ;;  %v3386_v22 = vld [vmem:[%s5222_s5 + $0x20] sm:$0xff] }
  0xab   :  { %v684_v20 = vpop.f32.mrf.mxu1  ;;  %1092 = vmatpush.bf16.msrb.mxu0 %v3389_v19  ;;  %v3390_v19 = vld [vmem:[%s5224_s7 + $0x4] sm:$0xf] }
  0xac   :  { %v685_v23 = vadd.f32 %v684_v20, %v671_v21  ;;  %v3388_v20 = vld [vmem:[%s5222_s5 + $0x30] sm:$0xff]  ;;  %v3387_v21 = vld [vmem:[%s5222_s5 + $0x28] sm:$0xff] }
  0xaf   :  { %v698_v18 = vpop.f32.mrf.mxu2  ;;  %1093 = vmatpush.bf16.msrb.mxu0 %v3388_v20 }
  0xb0   :  { %v699_v28 = vadd.f32 %v698_v18, %v685_v23  ;;  %v712_v30 = vpop.f32.mrf.mxu3  ;;  %v3385_v23 = vld [vmem:[%s5222_s5 + $0x18] sm:$0xff] }
  0xb2   :  { %v713_v32 = vadd.f32 %v712_v30, %v699_v28  ;;  %v3405_v28 = vld [vmem:[%s5224_s7 + $0x74] sm:$0xf0] }
  0xb3   :  { %1094 = vmatpush.bf16.msrb.mxu0 %v3387_v21  ;;  %v2760_v21 = vld [vmem:[%s5224_s7 + $0x8] sm:$0xf0] }
  0xb7   :  { %v752_v26 = vpop.f32.mrf.mxu2  ;;  %1095 = vmatpush.bf16.msrb.mxu0 %v3386_v22  ;;  %v2763_v22 = vor.u32 %v3390_v19, %v2760_v21  ;;  %v3104_v21 = vld [vmem:[%s5226_s9 + $0x24c] sm:$0xf0] }
  0xbb   :  { %1096 = vmatpush.bf16.msrb.mxu0 %v3385_v23  ;;  %v3242_v23 = vld [vmem:[%s5226_s9 + $0x348] sm:$0xf] }
  0xbf   :  { %v754_v40 = vpop.f32.mrf.mxu2 }
  0xc0   :  { %v724_v24 = vpop.f32.mrf.mxu0 }
  0xc1   :  { %v725_v29 = vadd.f32 %v724_v24, %v711_v25  ;;  %v3384_v24 = vld [vmem:[%s5222_s5 + $0x10] sm:$0xff]  ;;  %v3383_v25 = vld [vmem:[%s5222_s5 + $0x8] sm:$0xff] }
  0xc2   :  { %1097 = vmatpush.bf16.msrb.mxu0 %v3384_v24  ;;  %v3514_v24 = vld [vmem:[%s5226_s9 + $0x360] sm:$0xf0] }
  0xc3   :  { %v738_v27 = vpop.f32.mrf.mxu1 }
  0xc4   :  { %v739_v33 = vadd.f32 %v738_v27, %v725_v29  ;;  %v2814_v27 = vld [vmem:[%s5224_s7 + $0x70] sm:$0xf]  ;;  %v3404_v29 = vld [vmem:[%s5224_s7 + $0x74] sm:$0xf] }
  0xc5   :  { %v2815_v30 = vor.u32 %v3405_v28, %v2814_v27  ;;  %v3244_v27 = vld [vmem:[%s5226_s9 + $0x364] sm:$0xf0]  ;;  %v3214_v28 = vld [vmem:[%s5226_s9 + $0x310] sm:$0xf] }
  0xc6   :  { %v753_v39 = vadd.f32 %v752_v26, %v739_v33  ;;  %1098 = vmatpush.bf16.msrb.mxu0 %v3383_v25  ;;  %v3382_v26 = vld [vmem:[%s5222_s5] sm:$0xff]  ;;  %v3403_v33 = vld [vmem:[%s5224_s7 + $0x64] sm:$0xf0]  ;;  %v3511_v25 = vld [vmem:[%s5226_s9 + $0x34c] sm:$0xf] }
  0xc7   :  { %1211 = vmatpush.bf16.msrb.mxu2 %v2815_v30  ;;  %v3247_v30 = vor.u32 %v3511_v25, %v3244_v27  ;;  %v3420_v27 = vld [vmem:[%s5226_s9 + $0x74] sm:$0xf] }
  0xc8   :  { %v726_v34 = vpop.f32.mrf.mxu0  ;;  %v855_v45 = vmax.f32 %v753_v39, 0.0  ;;  %v766_v53 = vpop.f32.mrf.mxu3 }
  0xc9   :  { %v727_v35 = vadd.f32 %v726_v34, %v713_v32  ;;  %v767_v1 = vadd.f32 %v766_v53, %v162_v62  ;;  %v2806_v32 = vld [vmem:[%s5224_s7 + $0x60] sm:$0xf]  ;;  %v2819_v34 = vor.u32 %v3404_v29, %v2816_v31  ;;  %v3507_v29 = vld [vmem:[%s5226_s9 + $0x328] sm:$0xf0]  ;;  %v3504_v31 = vld [vmem:[%s5226_s9 + $0x314] sm:$0xf] }
  0xca   :  { %1099 = vmatpush.bf16.msrb.mxu0 %v3382_v26  ;;  %v3243_v26 = vor.u32 %v3514_v24, %v3242_v23  ;;  %v2878_v24 = vld [vmem:[%s5226_s9 + $0x70] sm:$0xf] }
  0xcb   :  { %v740_v38 = vpop.f32.mrf.mxu1  ;;  %v780_v50 = vpop.f32.mrf.mxu2  ;;  %1225 = vmatpush.bf16.msra.mxu1 %v2819_v34  ;;  %v3215_v34 = vor.u32 %v3507_v29, %v3214_v28  ;;  %v2880_v28 = vld [vmem:[%s5226_s9 + $0x8c] sm:$0xf0]  ;;  %v3522_v29 = vld [vmem:[%s5223_s6] ss:$0 sm:$0xff] }
  0xcc   :  { %v741_v41 = vadd.f32 %v740_v38, %v727_v35  ;;  %v781_v6 = vadd.f32 %v780_v50, %v767_v1  ;;  %v3402_v35 = vld [vmem:[%s5224_s7 + $0x64] sm:$0xf]  ;;  %v2807_v38 = vor.u32 %v3403_v33, %v2806_v32  ;;  %v3216_v32 = vld [vmem:[%s5226_s9 + $0x32c] sm:$0xf0]  ;;  %v3018_v33 = vld [vmem:[%s5226_s9 + $0x188] sm:$0xf] }
  0xcd   :  { %v2811_v39 = vor.u32 %v3402_v35, %v2808_v36  ;;  %v3398_v50 = vld [vmem:[%s5224_s7 + $0x44] sm:$0xf]  ;;  %v3455_v36 = vld [vmem:[%s5226_s9 + $0x18c] sm:$0xf] }
  0xce   :  { %v755_v42 = vadd.f32 %v754_v40, %v741_v41  ;;  %v2798_v40 = vld [vmem:[%s5224_s7 + $0x50] sm:$0xf]  ;;  %v3401_v41 = vld [vmem:[%s5224_s7 + $0x54] sm:$0xf0]  ;;  %1212 = vmatpush.bf16.msrb.mxu2 %v2807_v38  ;;  %v2795_v55 = vor.u32 %v3398_v50, %v2792_v51  ;;  %1979 = vmatpush.bf16.msra.mxu0 %v3243_v26  ;;  %v3458_v35 = vld [vmem:[%s5226_s9 + $0x1a0] sm:$0xf0] }
  0xcf   :  { %1226 = vmatpush.bf16.msra.mxu1 %v2811_v39  ;;  %v3020_v38 = vld [vmem:[%s5226_s9 + $0x1a4] sm:$0xf0]  ;;  %v3219_v39 = vor.u32 %v3504_v31, %v3216_v32  ;;  %v3448_v51 = vld [vmem:[%s5226_s9 + $0x154] sm:$0xf]  ;;  %v3423_v26 = vld [vmem:[%s5226_s9 + $0x88] sm:$0xf0] }
  0xd0   :  { %v857_v46 = vmax.f32 %v755_v42, 0.0  ;;  %v768_v58 = vpop.f32.mrf.mxu3  ;;  %v3400_v42 = vld [vmem:[%s5224_s7 + $0x54] sm:$0xf]  ;;  %v3074_v31 = vld [vmem:[%s5226_s9 + $0x1f8] sm:$0xf] }
  0xd1   :  { %v769_v3 = vadd.f32 %v768_v58, %v162_v62  ;;  %v3472_v32 = vld [vmem:[%s5226_s9 + $0x210] sm:$0xf0] }
  0xd2   :  { %v859_v49 = vpack.c.bf16 %v857_v46, %v855_v45  ;;  %v2799_v45 = vor.u32 %v3401_v41, %v2798_v40  ;;  %v2803_v46 = vor.u32 %v3400_v42, %v2800_v43  ;;  %v3019_v40 = vor.u32 %v3458_v35, %v3018_v33  ;;  %v3186_v42 = vld [vmem:[%s5226_s9 + $0x2d8] sm:$0xf]  ;;  %v3500_v43 = vld [vmem:[%s5226_s9 + $0x2f0] sm:$0xf0]  ;;  %1980 = vmatpush.bf16.msra.mxu0 %v3215_v34  ;;  %v3469_v33 = vld [vmem:[%s5226_s9 + $0x1fc] sm:$0xf] }
  0xd3   :  { %v782_v56 = vpop.f32.mrf.mxu2  ;;  %v3023_v41 = vor.u32 %v3455_v36, %v3020_v38  ;;  %v3076_v34 = vld [vmem:[%s5226_s9 + $0x214] sm:$0xf0]  ;;  %v2879_v35 = vor.u32 %v3423_v26, %v2878_v24  ;;  %v2883_v36 = vor.u32 %v3420_v27, %v2880_v28  ;;  %v3196_v24 = vld [vmem:[%s5226_s9 + $0x2fc] sm:$0xf0] }
  0xd4   :  { %1001 = vmatmul.bf16.vlgmr.msrb.gmra.mxu1 %v859_v49  ;;  %v783_v7 = vadd.f32 %v782_v56, %v769_v3  ;;  %v3399_v49 = vld [vmem:[%s5224_s7 + $0x44] sm:$0xf0]  ;;  %1213 = vmatpush.bf16.msrb.mxu2 %v2799_v45  ;;  %v3497_v45 = vld [vmem:[%s5226_s9 + $0x2dc] sm:$0xf]  ;;  %v2850_v38 = vld [vmem:[%s5226_s9 + $0x38] sm:$0xf] }
  0xd5   :  { %v2791_v53 = vor.u32 %v3399_v49, %v2790_v47  ;;  %1227 = vmatpush.bf16.msra.mxu1 %v2803_v46  ;;  %v3188_v46 = vld [vmem:[%s5226_s9 + $0x2f4] sm:$0xf0]  ;;  %v2990_v47 = vld [vmem:[%s5226_s9 + $0x150] sm:$0xf]  ;;  %v3451_v49 = vld [vmem:[%s5226_s9 + $0x168] sm:$0xf0]  ;;  %1965 = vmatpush.bf16.msra.mxu3 %v3019_v40 }
  0xd6   :  { %v2991_v50 = vor.u32 %v3451_v49, %v2990_v47  ;;  %v3416_v40 = vld [vmem:[%s5226_s9 + $0x50] sm:$0xf0]  ;;  %v3465_v47 = vld [vmem:[%s5226_s9 + $0x1d8] sm:$0xf0]  ;;  %v3462_v49 = vld [vmem:[%s5226_s9 + $0x1c4] sm:$0xf] }
  0xd8   :  { %1214 = vmatpush.bf16.msrb.mxu2 %v2791_v53  ;;  %v3187_v53 = vor.u32 %v3500_v43, %v3186_v42  ;;  %v2852_v42 = vld [vmem:[%s5226_s9 + $0x54] sm:$0xf0] }
  0xd9   :  { %1228 = vmatpush.bf16.msra.mxu1 %v2795_v55  ;;  %1966 = vmatpush.bf16.msra.mxu3 %v2991_v50 }
  0xda   :  { %1981 = vmatpush.bf16.msra.mxu0 %v3187_v53  ;;  %v3515_v53 = vld [vmem:[%s5226_s9 + $0x368] sm:$0xf0] }
  0xe0   :  { %v794_v59 = vpop.f32.mrf.mxu0 }
  0xe1   :  { %v795_v8 = vadd.f32 %v794_v59, %v781_v6  ;;  %v2782_v6 = vld [vmem:[%s5224_s7 + $0x30] sm:$0xf] }
  0xe3   :  { %v808_v0 = vpop.f32.mrf.mxu1 }
  0xe4   :  { %v809_v63 = vadd.f32 %v808_v0, %v795_v8 }
  0xe8   :  { %v822_v2 = vpop.f32.mrf.mxu3  ;;  %v796_v4 = vpop.f32.mrf.mxu0 }
  0xe9   :  { %v797_v54 = vadd.f32 %v796_v4, %v783_v7  ;;  %v823_v60 = vadd.f32 %v822_v2, %v809_v63  ;;  %v3397_v4 = vld [vmem:[%s5224_s7 + $0x34] sm:$0xf0]  ;;  %v3396_v7 = vld [vmem:[%s5224_s7 + $0x34] sm:$0xf]  ;;  %v2774_v63 = vld [vmem:[%s5224_s7 + $0x20] sm:$0xf] }
  0xea   :  { %v2783_v8 = vor.u32 %v3397_v4, %v2782_v6  ;;  %v2934_v6 = vld [vmem:[%s5226_s9 + $0xe0] sm:$0xf] }
  0xeb   :  { %v836_v61 = vpop.f32.mrf.mxu2  ;;  %v810_v37 = vpop.f32.mrf.mxu1 }
  0xec   :  { %v811_v10 = vadd.f32 %v810_v37, %v797_v54  ;;  %v837_v12 = vadd.f32 %v836_v61, %v823_v60  ;;  %v2784_v54 = vld [vmem:[%s5224_s7 + $0x38] sm:$0xf0]  ;;  %1215 = vmatpush.bf16.msrb.mxu2 %v2783_v8  ;;  %v3434_v8 = vld [vmem:[%s5226_s9 + $0xe4] sm:$0xf] }
  0xed   :  { %v2787_v37 = vor.u32 %v3396_v7, %v2784_v54  ;;  %v3437_v7 = vld [vmem:[%s5226_s9 + $0xf8] sm:$0xf0]  ;;  %v2936_v54 = vld [vmem:[%s5226_s9 + $0xfc] sm:$0xf0] }
  0xef   :  { %1229 = vmatpush.bf16.msra.mxu1 %v2787_v37 }
  0xf0   :  { %v824_v48 = vpop.f32.mrf.mxu3 }
  0xf1   :  { %v825_v11 = vadd.f32 %v824_v48, %v811_v10  ;;  %v3395_v48 = vld [vmem:[%s5224_s7 + $0x24] sm:$0xf0]  ;;  %v2776_v10 = vld [vmem:[%s5224_s7 + $0x28] sm:$0xf0] }
  0xf2   :  { %v2775_v60 = vor.u32 %v3395_v48, %v2774_v63  ;;  %v3130_v63 = vld [vmem:[%s5226_s9 + $0x268] sm:$0xf]  ;;  %v3486_v48 = vld [vmem:[%s5226_s9 + $0x280] sm:$0xf0] }
  0xf3   :  { %v838_v5 = vpop.f32.mrf.mxu2 }
  0xf4   :  { %v839_v13 = vadd.f32 %v838_v5, %v825_v11  ;;  %1216 = vmatpush.bf16.msrb.mxu2 %v2775_v60  ;;  %v3132_v60 = vld [vmem:[%s5226_s9 + $0x284] sm:$0xf0] }
  0xfb   :  { %v850_v44 = vpop.f32.mrf.mxu2 }
  0xfc   :  { %v851_v9 = vadd.f32 %v850_v44, %v837_v12  ;;  %v3394_v44 = vld [vmem:[%s5224_s7 + $0x24] sm:$0xf]  ;;  %v2766_v12 = vld [vmem:[%s5224_s7 + $0x10] sm:$0xf] }
  0xfd   :  { %v2779_v11 = vor.u32 %v3394_v44, %v2776_v10  ;;  %v3483_v44 = vld [vmem:[%s5226_s9 + $0x26c] sm:$0xf]  ;;  %v2935_v10 = vor.u32 %v3437_v7, %v2934_v6  ;;  %v3026_v6 = vld [vmem:[%s5226_s9 + $0x190] sm:$0xf] }
  0xfe   :  { %v856_v16 = vmax.f32 %v851_v9, 0.0  ;;  %v3392_v9 = vld [vmem:[%s5224_s7 + $0x14] sm:$0xf] }
  0xff   :  { %1230 = vmatpush.bf16.msra.mxu1 %v2779_v11  ;;  %v2939_v11 = vor.u32 %v3434_v8, %v2936_v54  ;;  %v3456_v54 = vld [vmem:[%s5226_s9 + $0x194] sm:$0xf] }
 0x103   :  { %v852_v14 = vpop.f32.mrf.mxu2 }
 0x104   :  { %v853_v15 = vadd.f32 %v852_v14, %v839_v13  ;;  %v3393_v13 = vld [vmem:[%s5224_s7 + $0x14] sm:$0xf0] }
 0x105   :  { %v2767_v14 = vor.u32 %v3393_v13, %v2766_v12  ;;  %v2906_v12 = vld [vmem:[%s5226_s9 + $0xa8] sm:$0xf]  ;;  %v3131_v13 = vor.u32 %v3486_v48, %v3130_v63 }
 0x106   :  { %v858_v17 = vmax.f32 %v853_v15, 0.0  ;;  %v2768_v15 = vld [vmem:[%s5224_s7 + $0x18] sm:$0xf0] }
 0x107   :  { %1217 = vmatpush.bf16.msrb.mxu2 %v2767_v14  ;;  %v3427_v14 = vld [vmem:[%s5226_s9 + $0xac] sm:$0xf] }
 0x108   :  { %v860_v18 = vpack.c.bf16 %v858_v17, %v856_v16  ;;  %v2771_v16 = vor.u32 %v3392_v9, %v2768_v15  ;;  %v2758_v17 = vld [vmem:[%s5224_s7] sm:$0xf]  ;;  %v3430_v9 = vld [vmem:[%s5226_s9 + $0xc0] sm:$0xf0]  ;;  %v2908_v15 = vld [vmem:[%s5226_s9 + $0xc4] sm:$0xf0] }
 0x109   :  { %v2911_v23 = vor.u32 %v3427_v14, %v2908_v15  ;;  %v2998_v15 = vld [vmem:[%s5226_s9 + $0x158] sm:$0xf] }
 0x10a   :  { %1015 = vmatmul.bf16.vlgmr.msrb.gmra.mxu3 %v860_v18  ;;  %1231 = vmatpush.bf16.msra.mxu1 %v2771_v16  ;;  %v3391_v18 = vld [vmem:[%s5224_s7 + $0x4] sm:$0xf0]  ;;  %v3135_v16 = vor.u32 %v3483_v44, %v3132_v60  ;;  %v3222_v44 = vld [vmem:[%s5226_s9 + $0x318] sm:$0xf]  ;;  %v3508_v60 = vld [vmem:[%s5226_s9 + $0x330] sm:$0xf0] }
 0x10b   :  { %v2759_v20 = vor.u32 %v3391_v18, %v2758_v17  ;;  %v3102_v17 = vld [vmem:[%s5226_s9 + $0x230] sm:$0xf]  ;;  %v3479_v18 = vld [vmem:[%s5226_s9 + $0x248] sm:$0xf0] }
 0x10c   :  { %v3103_v25 = vor.u32 %v3479_v18, %v3102_v17  ;;  %v3223_v17 = vor.u32 %v3508_v60, %v3222_v44  ;;  %v3449_v18 = vld [vmem:[%s5226_s9 + $0x15c] sm:$0xf]  ;;  %v2886_v44 = vld [vmem:[%s5226_s9 + $0x78] sm:$0xf]  ;;  %v3424_v60 = vld [vmem:[%s5226_s9 + $0x90] sm:$0xf0] }
 0x10d   :  { %1218 = vmatpush.bf16.msrb.mxu2 %v2759_v20  ;;  %v3476_v20 = vld [vmem:[%s5226_s9 + $0x234] sm:$0xf] }
 0x10e   :  { %1232 = vmatpush.bf16.msra.mxu1 %v2763_v22  ;;  %v2907_v22 = vor.u32 %v3430_v9, %v2906_v12  ;;  %v3224_v12 = vld [vmem:[%s5226_s9 + $0x334] sm:$0xf0] }
 0x111   :  { %1993 = vmatpush.bf16.msra.mxu2 %v3023_v41  ;;  %v3413_v41 = vld [vmem:[%s5226_s9 + $0x3c] sm:$0xf] }
 0x112   :  { %2007 = vmatpush.bf16.msrb.mxu1 %v3247_v30  ;;  %v3107_v30 = vor.u32 %v3476_v20, %v3104_v21  ;;  %v3194_v21 = vld [vmem:[%s5226_s9 + $0x2e0] sm:$0xf] }
 0x116   :  { %2008 = vmatpush.bf16.msrb.mxu1 %v3219_v39  ;;  %v3075_v39 = vor.u32 %v3472_v32, %v3074_v31  ;;  %v3491_v31 = vld [vmem:[%s5226_s9 + $0x2ac] sm:$0xf]  ;;  %v3168_v32 = vld [vmem:[%s5226_s9 + $0x2c4] sm:$0xf0] }
 0x151   :  { %v1002_v52 = vpop.f32.mrf.mxu1 }
 0x152   :  { %v1003_v59 = vadd.f32 %v3521_v57, %v1002_v52  ;;  %v2992_v52 = vld [vmem:[%s5226_s9 + $0x16c] sm:$0xf0] }
 0x153   :  { %v2995_v55 = vor.u32 %v3448_v51, %v2992_v52  ;;  %v3048_v51 = vld [vmem:[%s5226_s9 + $0x1dc] sm:$0xf0]  ;;  %v3250_v52 = vld [vmem:[%s5226_s9 + $0x350] sm:$0xf] }
 0x154   :  { %v3051_v7 = vor.u32 %v3462_v49, %v3048_v51  ;;  %v3251_v8 = vor.u32 %v3515_v53, %v3250_v52  ;;  %v3438_v51 = vld [vmem:[%s5226_s9 + $0x100] sm:$0xf0]  ;;  %v3435_v53 = vld [vmem:[%s5226_s9 + $0xec] sm:$0xf] }
 0x155   :  { %1994 = vmatpush.bf16.msra.mxu2 %v2995_v55 }
 0x159   :  { %v1004_v58 = vpop.f32.mrf.mxu1 }
 0x15a   :  { %v1005_v61 = vadd.f32 %v3521_v57, %v1004_v58  ;;  %v3493_v57 = vld [vmem:[%s5226_s9 + $0x2b8] sm:$0xf0]  ;;  %v3191_v58 = vor.u32 %v3497_v45, %v3188_v46  ;;  %v3079_v45 = vor.u32 %v3469_v33, %v3076_v34  ;;  %v3046_v46 = vld [vmem:[%s5226_s9 + $0x1c0] sm:$0xf]  ;;  %v3171_v34 = vor.u32 %v3491_v31, %v3168_v32 }
 0x15b   :  { %v1125_v31 = vld [vmem:[%s5225_s8] sm:$0x3] }
 0x15c   :  { %2009 = vmatpush.bf16.msrb.mxu1 %v3191_v58  ;;  %v3252_v58 = vld [vmem:[%s5226_s9 + $0x36c] sm:$0xf0] }
 0x18d   :  { %v1016_v56 = vpop.f32.mrf.mxu3 }
 0x18e   :  { %v1017_v62 = vadd.f32 %v1016_v56, %v1003_v59  ;;  %v3158_v56 = vld [vmem:[%s5226_s9 + $0x2a0] sm:$0xf]  ;;  %v2962_v59 = vld [vmem:[%s5226_s9 + $0x118] sm:$0xf] }
 0x18f   :  { %v3159_v4 = vor.u32 %v3493_v57, %v3158_v56  ;;  %v2851_v56 = vor.u32 %v3416_v40, %v2850_v38  ;;  %v3512_v57 = vld [vmem:[%s5226_s9 + $0x354] sm:$0xf]  ;;  %v2972_v40 = vld [vmem:[%s5226_s9 + $0x13c] sm:$0xf0] }
 0x190   :  { %v1021_v2 = vmax.f32 %v1017_v62, 0.0  ;;  %v3441_v62 = vld [vmem:[%s5226_s9 + $0x11c] sm:$0xf]  ;;  %v3255_v48 = vor.u32 %v3512_v57, %v3252_v58  ;;  %v3110_v57 = vld [vmem:[%s5226_s9 + $0x238] sm:$0xf] }
 0x191   :  { %1982 = vmatpush.bf16.msra.mxu0 %v3159_v4  ;;  %v3459_v4 = vld [vmem:[%s5226_s9 + $0x1a8] sm:$0xf0]  ;;  %v3480_v58 = vld [vmem:[%s5226_s9 + $0x250] sm:$0xf0] }
 0x192   :  { %v3027_v9 = vor.u32 %v3459_v4, %v3026_v6  ;;  %v2916_v6 = vld [vmem:[%s5226_s9 + $0xcc] sm:$0xf0] }
 0x195   :  { %v1018_v0 = vpop.f32.mrf.mxu3  ;;  %1983 = vmatpush.bf16.msra.mxu0 %v3131_v13 }
 0x196   :  { %v1019_v1 = vadd.f32 %v1018_v0, %v1005_v61  ;;  %v3444_v61 = vld [vmem:[%s5226_s9 + $0x130] sm:$0xf0]  ;;  %v3490_v0 = vld [vmem:[%s5226_s9 + $0x2a4] sm:$0xf] }
 0x198   :  { %v1022_v3 = vmax.f32 %v1019_v1, 0.0  ;;  %v3160_v1 = vld [vmem:[%s5226_s9 + $0x2bc] sm:$0xf0] }
 0x199   :  { %v3163_v37 = vor.u32 %v3490_v0, %v3160_v1  ;;  %1984 = vmatpush.bf16.msra.mxu0 %v3103_v25  ;;  %v3409_v0 = vld [vmem:[%s5226_s9 + $0x18] sm:$0xf0]  ;;  %v3406_v1 = vld [vmem:[%s5226_s9 + $0x4] sm:$0xf] }
 0x19a   :  { %v1023_v5 = vpack.c.bf16 %v1022_v3, %v1021_v2  ;;  %v2964_v2 = vld [vmem:[%s5226_s9 + $0x134] sm:$0xf0]  ;;  %v2963_v3 = vor.u32 %v3444_v61, %v2962_v59  ;;  %v2855_v59 = vor.u32 %v3413_v41, %v2852_v42  ;;  %v2822_v61 = vld [vmem:[%s5226_s9] sm:$0xf]  ;;  %v3138_v42 = vld [vmem:[%s5226_s9 + $0x270] sm:$0xf] }
 0x19b   :  { %2010 = vmatpush.bf16.msrb.mxu1 %v3163_v37  ;;  %v3028_v37 = vld [vmem:[%s5226_s9 + $0x1ac] sm:$0xf0] }
 0x19c   :  { %1100 = vmatmul.bf16.vlgmr.msrb.gmra.mxu0 %v1023_v5  ;;  %v2967_v5 = vor.u32 %v3441_v62, %v2964_v2  ;;  %1967 = vmatpush.bf16.msra.mxu3 %v2963_v3  ;;  %v3047_v62 = vor.u32 %v3465_v47, %v3046_v46  ;;  %v2824_v2 = vld [vmem:[%s5226_s9 + $0x1c] sm:$0xf0]  ;;  %v3031_v14 = vor.u32 %v3456_v54, %v3028_v37  ;;  %v3484_v46 = vld [vmem:[%s5226_s9 + $0x274] sm:$0xf]  ;;  %v3140_v47 = vld [vmem:[%s5226_s9 + $0x28c] sm:$0xf0] }
 0x19d   :  { %1985 = vmatpush.bf16.msra.mxu0 %v3075_v39  ;;  %v2827_v13 = vor.u32 %v3406_v1, %v2824_v2  ;;  %v3442_v39 = vld [vmem:[%s5226_s9 + $0x124] sm:$0xf]  ;;  %v3143_v49 = vor.u32 %v3484_v46, %v3140_v47  ;;  %v2914_v1 = vld [vmem:[%s5226_s9 + $0xb0] sm:$0xf]  ;;  %v3431_v2 = vld [vmem:[%s5226_s9 + $0xc8] sm:$0xf0] }
 0x19e   :  { %1995 = vmatpush.bf16.msra.mxu2 %v2967_v5  ;;  %v2975_v41 = vor.u32 %v3442_v39, %v2972_v40  ;;  %v3470_v37 = vld [vmem:[%s5226_s9 + $0x204] sm:$0xf]  ;;  %v3258_v39 = vld [vmem:[%s5226_s9 + $0x358] sm:$0xf] }
 0x19f   :  { %2011 = vmatpush.bf16.msrb.mxu1 %v3135_v16  ;;  %v3452_v16 = vld [vmem:[%s5226_s9 + $0x170] sm:$0xf0] }
 0x1a0   :  { %1968 = vmatpush.bf16.msra.mxu3 %v2935_v10  ;;  %v2823_v10 = vor.u32 %v3409_v0, %v2822_v61  ;;  %v2999_v25 = vor.u32 %v3452_v16, %v2998_v15  ;;  %v3477_v61 = vld [vmem:[%s5226_s9 + $0x23c] sm:$0xf]  ;;  %v3463_v16 = vld [vmem:[%s5226_s9 + $0x1cc] sm:$0xf] }
 0x1a1   :  { %1986 = vmatpush.bf16.msra.mxu0 %v3047_v62  ;;  %v3112_v62 = vld [vmem:[%s5226_s9 + $0x254] sm:$0xf0] }
 0x1a2   :  { %1996 = vmatpush.bf16.msra.mxu2 %v2939_v11  ;;  %v3505_v11 = vld [vmem:[%s5226_s9 + $0x31c] sm:$0xf]  ;;  %v3115_v0 = vor.u32 %v3477_v61, %v3112_v62  ;;  %v3460_v61 = vld [vmem:[%s5226_s9 + $0x1b0] sm:$0xf0] }
 0x1a3   :  { %2012 = vmatpush.bf16.msrb.mxu1 %v3107_v30  ;;  %v3227_v20 = vor.u32 %v3505_v11, %v3224_v12  ;;  %v3494_v30 = vld [vmem:[%s5226_s9 + $0x2c0] sm:$0xf0]  ;;  %v3421_v11 = vld [vmem:[%s5226_s9 + $0x7c] sm:$0xf]  ;;  %v2888_v12 = vld [vmem:[%s5226_s9 + $0x94] sm:$0xf0] }
 0x1a4   :  { %1969 = vmatpush.bf16.msra.mxu3 %v2907_v22  ;;  %v3501_v22 = vld [vmem:[%s5226_s9 + $0x2f8] sm:$0xf0] }
 0x1a5   :  { %2035 = vmatpush.bf16.msrb.mxu0 %v3251_v8  ;;  %v3195_v27 = vor.u32 %v3501_v22, %v3194_v21  ;;  %v3473_v8 = vld [vmem:[%s5226_s9 + $0x218] sm:$0xf0]  ;;  %v3414_v22 = vld [vmem:[%s5226_s9 + $0x44] sm:$0xf] }
 0x1a6   :  { %1997 = vmatpush.bf16.msra.mxu2 %v2911_v23  ;;  %v3498_v23 = vld [vmem:[%s5226_s9 + $0x2e4] sm:$0xf]  ;;  %v3457_v62 = vld [vmem:[%s5226_s9 + $0x19c] sm:$0xf] }
 0x1a7   :  { %2013 = vmatpush.bf16.msrb.mxu1 %v3079_v45  ;;  %v3199_v28 = vor.u32 %v3498_v23, %v3196_v24  ;;  %v2860_v23 = vld [vmem:[%s5226_s9 + $0x5c] sm:$0xf0] }
 0x1a8   :  { %1970 = vmatpush.bf16.msra.mxu3 %v2879_v35  ;;  %v2970_v35 = vld [vmem:[%s5226_s9 + $0x120] sm:$0xf]  ;;  %v2863_v24 = vor.u32 %v3414_v22, %v2860_v23 }
 0x1a9   :  { %2036 = vmatpush.bf16.msrb.mxu0 %v3223_v17  ;;  %v3056_v17 = vld [vmem:[%s5226_s9 + $0x1e4] sm:$0xf0] }
 0x1aa   :  { %1998 = vmatpush.bf16.msra.mxu2 %v2883_v36  ;;  %v3445_v36 = vld [vmem:[%s5226_s9 + $0x138] sm:$0xf0] }
 0x1ab   :  { %2014 = vmatpush.bf16.msrb.mxu1 %v3051_v7  ;;  %v2971_v38 = vor.u32 %v3445_v36, %v2970_v35  ;;  %v3082_v7 = vld [vmem:[%s5226_s9 + $0x200] sm:$0xf]  ;;  %v1127_v36 = vperm.slane %v1125_v31, 0 }
 0x1ac   :  { %1971 = vmatpush.bf16.msra.mxu3 %v2851_v56  ;;  %v3083_v54 = vor.u32 %v3473_v8, %v3082_v7  ;;  %v3499_v7 = vld [vmem:[%s5226_s9 + $0x2ec] sm:$0xf]  ;;  %v3204_v8 = vld [vmem:[%s5226_s9 + $0x304] sm:$0xf0] }
 0x1ad   :  { %2037 = vmatpush.bf16.msrb.mxu0 %v3195_v27 }
 0x1ae   :  { %1999 = vmatpush.bf16.msra.mxu2 %v2855_v59  ;;  %v3111_v59 = vor.u32 %v3480_v58, %v3110_v57  ;;  %v3034_v58 = vld [vmem:[%s5226_s9 + $0x198] sm:$0xf] }
 0x1b0   :  { %1972 = vmatpush.bf16.msra.mxu3 %v2823_v10  ;;  %v2887_v10 = vor.u32 %v3424_v60, %v2886_v44  ;;  %v3453_v44 = vld [vmem:[%s5226_s9 + $0x178] sm:$0xf0]  ;;  %v3450_v60 = vld [vmem:[%s5226_s9 + $0x164] sm:$0xf] }
 0x1b2   :  { %2000 = vmatpush.bf16.msra.mxu2 %v2827_v13  ;;  %v2891_v13 = vor.u32 %v3421_v11, %v2888_v12  ;;  %v3207_v12 = vor.u32 %v3499_v7, %v3204_v8 }
 0x1b4   :  { %2021 = vmatpush.bf16.msrb.mxu3 %v3027_v9  ;;  %v3054_v9 = vld [vmem:[%s5226_s9 + $0x1c8] sm:$0xf] }
 0x1b8   :  { %2022 = vmatpush.bf16.msrb.mxu3 %v2999_v25  ;;  %v2830_v25 = vld [vmem:[%s5226_s9 + $0x8] sm:$0xf] }
 0x1bc   :  { %2023 = vmatpush.bf16.msrb.mxu3 %v2971_v38 }
 0x219   :  { %v1101_v19 = vpop.f32.mrf.mxu0 }
 0x21a   :  { %v1102_v43 = vadd.f32 %v3522_v29, %v1101_v19  ;;  %v3000_v19 = vld [vmem:[%s5226_s9 + $0x174] sm:$0xf0] }
 0x21b   :  { %v3003_v26 = vor.u32 %v3449_v18, %v3000_v19  ;;  %v3059_v18 = vor.u32 %v3463_v16, %v3056_v17  ;;  %v2858_v19 = vld [vmem:[%s5226_s9 + $0x40] sm:$0xf] }
 0x21c   :  { %v1106_v3 = vmax.f32 %v1102_v43, 0.0  ;;  %v3487_v43 = vld [vmem:[%s5226_s9 + $0x288] sm:$0xf0] }
 0x21d   :  { %v3139_v45 = vor.u32 %v3487_v43, %v3138_v42  ;;  %v3513_v42 = vld [vmem:[%s5226_s9 + $0x35c] sm:$0xf]  ;;  %v3260_v43 = vld [vmem:[%s5226_s9 + $0x374] sm:$0xf0] }
 0x221   :  { %v1103_v50 = vpop.f32.mrf.mxu0 }
 0x222   :  { %v1104_v55 = vadd.f32 %v3522_v29, %v1103_v50  ;;  %v3166_v29 = vld [vmem:[%s5226_s9 + $0x2a8] sm:$0xf] }
 0x223   :  { %v3167_v33 = vor.u32 %v3494_v30, %v3166_v29  ;;  %v2942_v50 = vld [vmem:[%s5226_s9 + $0xe8] sm:$0xf] }
 0x224   :  { %v1107_v5 = vmax.f32 %v1104_v55, 0.0  ;;  %v2943_v52 = vor.u32 %v3438_v51, %v2942_v50  ;;  %v2944_v55 = vld [vmem:[%s5226_s9 + $0x104] sm:$0xf0]  ;;  %v3230_v50 = vld [vmem:[%s5226_s9 + $0x320] sm:$0xf] }
 0x225   :  { %2038 = vmatpush.bf16.msrb.mxu0 %v3167_v33  ;;  %v2947_v56 = vor.u32 %v3435_v53, %v2944_v55  ;;  %v2832_v29 = vld [vmem:[%s5226_s9 + $0x24] sm:$0xf0]  ;;  %v1128_v33 = vperm.slane %v1125_v31, 1  ;;  %v3509_v53 = vld [vmem:[%s5226_s9 + $0x338] sm:$0xf0] }
 0x226   :  { %v1108_v63 = vpack.c.bf16 %v1107_v5, %v1106_v3  ;;  %2024 = vmatpush.bf16.msrb.mxu3 %v2943_v52  ;;  %v2915_v3 = vor.u32 %v3431_v2, %v2914_v1  ;;  %v3428_v5 = vld [vmem:[%s5226_s9 + $0xb4] sm:$0xf]  ;;  %v3506_v55 = vld [vmem:[%s5226_s9 + $0x324] sm:$0xf]  ;;  %v3231_v1 = vor.u32 %v3509_v53, %v3230_v50  ;;  %v3439_v31 = vld [vmem:[%s5226_s9 + $0x108] sm:$0xf0] }
 0x227   :  { %v2919_v4 = vor.u32 %v3428_v5, %v2916_v6  ;;  %v3502_v5 = vld [vmem:[%s5226_s9 + $0x300] sm:$0xf0] }
 0x228   :  { %1219 = vmatmul.bf16.vlgmr.msrb.gmra.mxu2 %v1108_v63  ;;  %1233 = vmatmul.bf16.vlgmr.msra.gmra.mxu1 %v1108_v63  ;;  %v3084_v63 = vld [vmem:[%s5226_s9 + $0x21c] sm:$0xf0]  ;;  %v3474_v53 = vld [vmem:[%s5226_s9 + $0x220] sm:$0xf0] }
 0x229   :  { %2063 = vmatpush.bf16.msra.mxu1 %v3255_v48  ;;  %2049 = vmatpush.bf16.msrb.mxu2 %v3031_v14  ;;  %v3087_v48 = vor.u32 %v3470_v37, %v3084_v63  ;;  %v3466_v14 = vld [vmem:[%s5226_s9 + $0x1e0] sm:$0xf0]  ;;  %v3006_v63 = vld [vmem:[%s5226_s9 + $0x160] sm:$0xf] }
 0x22a   :  { %2039 = vmatpush.bf16.msrb.mxu0 %v3139_v45  ;;  %2025 = vmatpush.bf16.msrb.mxu3 %v2915_v3  ;;  %v3055_v15 = vor.u32 %v3466_v14, %v3054_v9  ;;  %v3202_v3 = vld [vmem:[%s5226_s9 + $0x2e8] sm:$0xf]  ;;  %v3495_v9 = vld [vmem:[%s5226_s9 + $0x2c8] sm:$0xf0]  ;;  %v3492_v14 = vld [vmem:[%s5226_s9 + $0x2b4] sm:$0xf]  ;;  %v3007_v16 = vor.u32 %v3453_v44, %v3006_v63 }
 0x22b   :  { %v3203_v11 = vor.u32 %v3502_v5, %v3202_v3  ;;  %v3062_v3 = vld [vmem:[%s5226_s9 + $0x1d0] sm:$0xf]  ;;  %v3467_v5 = vld [vmem:[%s5226_s9 + $0x1e8] sm:$0xf0]  ;;  %v2866_v63 = vld [vmem:[%s5226_s9 + $0x48] sm:$0xf] }
 0x22c   :  { %v3418_v44 = vld [vmem:[%s5226_s9 + $0x60] sm:$0xf0] }
 0x22d   :  { %2064 = vmatpush.bf16.msra.mxu1 %v3227_v20  ;;  %2050 = vmatpush.bf16.msrb.mxu2 %v3003_v26  ;;  %v3417_v20 = vld [vmem:[%s5226_s9 + $0x58] sm:$0xf0]  ;;  %v3410_v26 = vld [vmem:[%s5226_s9 + $0x20] sm:$0xf0] }
 0x22e   :  { %2040 = vmatpush.bf16.msrb.mxu0 %v3111_v59  ;;  %2026 = vmatpush.bf16.msrb.mxu3 %v2887_v10  ;;  %v2859_v21 = vor.u32 %v3417_v20, %v2858_v19  ;;  %v2831_v27 = vor.u32 %v3410_v26, %v2830_v25  ;;  %v3008_v10 = vld [vmem:[%s5226_s9 + $0x17c] sm:$0xf0]  ;;  %v3446_v19 = vld [vmem:[%s5226_s9 + $0x140] sm:$0xf0]  ;;  %v3443_v20 = vld [vmem:[%s5226_s9 + $0x12c] sm:$0xf] }
 0x22f   :  { %v3011_v17 = vor.u32 %v3450_v60, %v3008_v10  ;;  %v3488_v25 = vld [vmem:[%s5226_s9 + $0x290] sm:$0xf0]  ;;  %v3485_v26 = vld [vmem:[%s5226_s9 + $0x27c] sm:$0xf]  ;;  %v3415_v60 = vld [vmem:[%s5226_s9 + $0x4c] sm:$0xf] }
 0x230   :  { %v2868_v10 = vld [vmem:[%s5226_s9 + $0x64] sm:$0xf0] }
 0x231   :  { %2065 = vmatpush.bf16.msra.mxu1 %v3199_v28  ;;  %2051 = vmatpush.bf16.msrb.mxu2 %v2975_v41  ;;  %v3407_v28 = vld [vmem:[%s5226_s9 + $0xc] sm:$0xf]  ;;  %v3516_v41 = vld [vmem:[%s5226_s9 + $0x370] sm:$0xf0] }
 0x232   :  { %2041 = vmatpush.bf16.msrb.mxu0 %v3083_v54  ;;  %2027 = vmatpush.bf16.msrb.mxu3 %v2859_v21  ;;  %v2835_v30 = vor.u32 %v3407_v28, %v2832_v29  ;;  %v3259_v47 = vor.u32 %v3516_v41, %v3258_v39  ;;  %v3035_v54 = vor.u32 %v3460_v61, %v3034_v58  ;;  %v2980_v21 = vld [vmem:[%s5226_s9 + $0x144] sm:$0xf0]  ;;  %v3478_v39 = vld [vmem:[%s5226_s9 + $0x244] sm:$0xf]  ;;  %v3425_v61 = vld [vmem:[%s5226_s9 + $0x98] sm:$0xf0] }
 0x233   :  { %v2983_v29 = vor.u32 %v3443_v20, %v2980_v21  ;;  %v2840_v20 = vld [vmem:[%s5226_s9 + $0x2c] sm:$0xf0]  ;;  %v3042_v21 = vld [vmem:[%s5226_s9 + $0x1a0] sm:$0xf] }
 0x235   :  { %2066 = vmatpush.bf16.msra.mxu1 %v3171_v34  ;;  %2052 = vmatpush.bf16.msrb.mxu2 %v2947_v56  ;;  %v3232_v56 = vld [vmem:[%s5226_s9 + $0x33c] sm:$0xf0] }
 0x236   :  { %2042 = vmatpush.bf16.msrb.mxu0 %v3055_v15  ;;  %2028 = vmatpush.bf16.msrb.mxu3 %v2831_v27  ;;  %v3235_v2 = vor.u32 %v3506_v55, %v3232_v56  ;;  %v3176_v15 = vld [vmem:[%s5226_s9 + $0x2cc] sm:$0xf0]  ;;  %v3148_v27 = vld [vmem:[%s5226_s9 + $0x294] sm:$0xf0]  ;;  %v3471_v55 = vld [vmem:[%s5226_s9 + $0x20c] sm:$0xf] }
 0x237   :  { %v3179_v23 = vor.u32 %v3492_v14, %v3176_v15  ;;  %v3092_v56 = vld [vmem:[%s5226_s9 + $0x224] sm:$0xf0]  ;;  %v2871_v14 = vor.u32 %v3415_v60, %v2868_v10 }
 0x238   :  { %v3238_v15 = vld [vmem:[%s5226_s9 + $0x328] sm:$0xf] }
 0x239   :  { %2067 = vmatpush.bf16.msra.mxu1 %v3143_v49  ;;  %2053 = vmatpush.bf16.msrb.mxu2 %v2919_v4  ;;  %v3263_v49 = vor.u32 %v3513_v42, %v3260_v43  ;;  %v2922_v43 = vld [vmem:[%s5226_s9 + $0xb8] sm:$0xf] }
 0x23d   :  { %2068 = vmatpush.bf16.msra.mxu1 %v3115_v0  ;;  %2054 = vmatpush.bf16.msrb.mxu2 %v2891_v13  ;;  %v3036_v0 = vld [vmem:[%s5226_s9 + $0x1b4] sm:$0xf0]  ;;  %v3174_v13 = vld [vmem:[%s5226_s9 + $0x2b0] sm:$0xf] }
 0x23e   :  { %v3039_v37 = vor.u32 %v3457_v62, %v3036_v0  ;;  %v3175_v22 = vor.u32 %v3495_v9, %v3174_v13  ;;  %v3422_v62 = vld [vmem:[%s5226_s9 + $0x84] sm:$0xf]  ;;  %v2896_v0 = vld [vmem:[%s5226_s9 + $0x9c] sm:$0xf0]  ;;  %v2867_v9 = vor.u32 %v3418_v44, %v2866_v63 }
 0x23f   :  { %v2899_v8 = vor.u32 %v3422_v62, %v2896_v0  ;;  %v3070_v62 = vld [vmem:[%s5226_s9 + $0x1d8] sm:$0xf]  ;;  %v3468_v0 = vld [vmem:[%s5226_s9 + $0x1f0] sm:$0xf0]  ;;  %v5205_v63 = vld [vmem:[%s5227_s10] sm:$0x7f] }
 0x240   :  { %v1375_v44 = vperm.slane %v5205_v63, 0  ;;  %v1376_v60 = vperm.slane %v5205_v63, 1 }
 0x241   :  { %2069 = vmatpush.bf16.msra.mxu1 %v3087_v48  ;;  %2055 = vmatpush.bf16.msrb.mxu2 %v2863_v24  ;;  %v3146_v24 = vld [vmem:[%s5226_s9 + $0x278] sm:$0xf] }
 0x245   :  { %2070 = vmatpush.bf16.msra.mxu1 %v3059_v18  ;;  %2056 = vmatpush.bf16.msrb.mxu2 %v2835_v30  ;;  %v2978_v18 = vld [vmem:[%s5226_s9 + $0x128] sm:$0xf]  ;;  %v2950_v30 = vld [vmem:[%s5226_s9 + $0xf0] sm:$0xf] }
 0x246   :  { %v2979_v28 = vor.u32 %v3446_v19, %v2978_v18  ;;  %v2951_v41 = vor.u32 %v3439_v31, %v2950_v30  ;;  %v3411_v18 = vld [vmem:[%s5226_s9 + $0x28] sm:$0xf0]  ;;  %v3408_v19 = vld [vmem:[%s5226_s9 + $0x14] sm:$0xf]  ;;  %v3454_v30 = vld [vmem:[%s5226_s9 + $0x180] sm:$0xf0] }
 0x2a5   :  { %v1234_v32 = vpop.f32.mrf.mxu1 }
 0x2a6   :  { %v1235_v35 = vadd.f32 %v1234_v32, %v1128_v33  ;;  %v3436_v32 = vld [vmem:[%s5226_s9 + $0xf4] sm:$0xf] }
 0x2a8   :  { %v1240_v45 = vmax.f32 %v1235_v35, 0.0  ;;  %v3151_v35 = vor.u32 %v3485_v26, %v3148_v27  ;;  %v3210_v26 = vld [vmem:[%s5226_s9 + $0x2f0] sm:$0xf]  ;;  %v3503_v27 = vld [vmem:[%s5226_s9 + $0x308] sm:$0xf0] }
 0x2a9   :  { %v3211_v31 = vor.u32 %v3503_v27, %v3210_v26 }
 0x2ab   :  { %v1220_v34 = vpop.f32.mrf.mxu2 }
 0x2ac   :  { %v1221_v51 = vadd.f32 %v1220_v34, %v1127_v36  ;;  %v3147_v34 = vor.u32 %v3488_v25, %v3146_v24  ;;  %v2843_v25 = vor.u32 %v3408_v19, %v2840_v20 }
 0x2ad   :  { %v1236_v38 = vpop.f32.mrf.mxu1 }
 0x2ae   :  { %v1237_v40 = vadd.f32 %v1236_v38, %v1128_v33  ;;  %v1239_v6 = vmax.f32 %v1221_v51, 0.0  ;;  %v2952_v33 = vld [vmem:[%s5226_s9 + $0x10c] sm:$0xf0]  ;;  %v3481_v38 = vld [vmem:[%s5226_s9 + $0x258] sm:$0xf0] }
 0x2af   :  { %v2955_v42 = vor.u32 %v3436_v32, %v2952_v33  ;;  %v3090_v51 = vld [vmem:[%s5226_s9 + $0x208] sm:$0xf]  ;;  %v3182_v32 = vld [vmem:[%s5226_s9 + $0x2b8] sm:$0xf]  ;;  %v3496_v33 = vld [vmem:[%s5226_s9 + $0x2d0] sm:$0xf0] }
 0x2b0   :  { %v1242_v46 = vmax.f32 %v1237_v40, 0.0  ;;  %v3120_v40 = vld [vmem:[%s5226_s9 + $0x25c] sm:$0xf0] }
 0x2b1   :  { %v3123_v50 = vor.u32 %v3478_v39, %v3120_v40  ;;  %v3154_v39 = vld [vmem:[%s5226_s9 + $0x280] sm:$0xf]  ;;  %v3489_v40 = vld [vmem:[%s5226_s9 + $0x298] sm:$0xf0] }
 0x2b2   :  { %v4911_v52 = vpack.c.bf16 %v1242_v46, %v1240_v45  ;;  %v3432_v45 = vld [vmem:[%s5226_s9 + $0xd0] sm:$0xf0]  ;;  %v3429_v46 = vld [vmem:[%s5226_s9 + $0xbc] sm:$0xf] }
 0x2b3   :  { %v1222_v57 = vpop.f32.mrf.mxu2 }
 0x2b4   :  { %v1223_v59 = vadd.f32 %v1222_v57, %v1127_v36  ;;  %1987 = vmatmul.bf16.vlgmr.msra.gmra.mxu0 %v4911_v52  ;;  %2015 = vmatmul.bf16.vlgmr.msrb.gmra.mxu1 %v4911_v52  ;;  %v3118_v36 = vld [vmem:[%s5226_s9 + $0x240] sm:$0xf]  ;;  %v2923_v57 = vor.u32 %v3432_v45, %v2922_v43  ;;  %v3440_v43 = vld [vmem:[%s5226_s9 + $0x110] sm:$0xf0]  ;;  %v3155_v45 = vor.u32 %v3489_v40, %v3154_v39 }
 0x2b5   :  { %2091 = vmatpush.bf16.msra.mxu0 %v3259_v47  ;;  %2119 = vmatpush.bf16.msrb.mxu1 %v3263_v49  ;;  %v2924_v47 = vld [vmem:[%s5226_s9 + $0xd4] sm:$0xf0]  ;;  %v3119_v49 = vor.u32 %v3481_v38, %v3118_v36  ;;  %v3447_v36 = vld [vmem:[%s5226_s9 + $0x148] sm:$0xf0]  ;;  %v3183_v38 = vor.u32 %v3496_v33, %v3182_v32 }
 0x2b6   :  { %v1241_v4 = vmax.f32 %v1223_v59, 0.0  ;;  %v2927_v58 = vor.u32 %v3429_v46, %v2924_v47  ;;  %v2894_v59 = vld [vmem:[%s5226_s9 + $0x80] sm:$0xf]  ;;  %v3126_v46 = vld [vmem:[%s5226_s9 + $0x248] sm:$0xf] }
 0x2b7   :  { %v2895_v7 = vor.u32 %v3425_v61, %v2894_v59  ;;  %v3482_v47 = vld [vmem:[%s5226_s9 + $0x260] sm:$0xf0] }
 0x2b8   :  { %v4951_v48 = vpack.c.bf16 %v1241_v4, %v1239_v6  ;;  %v3464_v6 = vld [vmem:[%s5226_s9 + $0x1d4] sm:$0xf]  ;;  %v3064_v4 = vld [vmem:[%s5226_s9 + $0x1ec] sm:$0xf0]  ;;  %v3426_v59 = vld [vmem:[%s5226_s9 + $0xa0] sm:$0xf0] }
 0x2b9   :  { %2092 = vmatpush.bf16.msra.mxu0 %v3231_v1  ;;  %2120 = vmatpush.bf16.msrb.mxu1 %v3235_v2  ;;  %v3091_v1 = vor.u32 %v3474_v53, %v3090_v51  ;;  %v3095_v2 = vor.u32 %v3471_v55, %v3092_v56  ;;  %v3433_v51 = vld [vmem:[%s5226_s9 + $0xd8] sm:$0xf0]  ;;  %v3127_v53 = vor.u32 %v3482_v47, %v3126_v46  ;;  %v3098_v55 = vld [vmem:[%s5226_s9 + $0x210] sm:$0xf]  ;;  %v3475_v56 = vld [vmem:[%s5226_s9 + $0x228] sm:$0xf0] }
 0x2ba   :  { %1973 = vmatmul.bf16.vlgmr.msra.gmra.mxu3 %v4951_v48  ;;  %2001 = vmatmul.bf16.vlgmr.msra.gmra.mxu2 %v4951_v48  ;;  %v3099_v61 = vor.u32 %v3475_v56, %v3098_v55 }
 0x2bb   :  { %2077 = vmatpush.bf16.msra.mxu3 %v3035_v54  ;;  %2105 = vmatpush.bf16.msra.mxu2 %v3039_v37  ;;  %v3266_v54 = vld [vmem:[%s5226_s9 + $0x360] sm:$0xf]  ;;  %v3517_v37 = vld [vmem:[%s5226_s9 + $0x378] sm:$0xf0] }
 0x2bc   :  { %v3267_v13 = vor.u32 %v3517_v37, %v3266_v54 }
 0x2bd   :  { %2093 = vmatpush.bf16.msra.mxu0 %v3203_v11  ;;  %2121 = vmatpush.bf16.msrb.mxu1 %v3207_v12  ;;  %v3063_v11 = vor.u32 %v3467_v5, %v3062_v3  ;;  %v3067_v12 = vor.u32 %v3464_v6, %v3064_v4  ;;  %v3419_v3 = vld [vmem:[%s5226_s9 + $0x68] sm:$0xf0]  ;;  %v3071_v5 = vor.u32 %v3468_v0, %v3070_v62  ;;  %v2846_v4 = vld [vmem:[%s5226_s9 + $0x18] sm:$0xf] }
 0x2bf   :  { %2078 = vmatpush.bf16.msra.mxu3 %v3007_v16  ;;  %2106 = vmatpush.bf16.msra.mxu2 %v3011_v17  ;;  %v3510_v16 = vld [vmem:[%s5226_s9 + $0x340] sm:$0xf0]  ;;  %v2838_v17 = vld [vmem:[%s5226_s9 + $0x10] sm:$0xf] }
 0x2c0   :  { %v2839_v24 = vor.u32 %v3411_v18, %v2838_v17 }
 0x2c1   :  { %2094 = vmatpush.bf16.msra.mxu0 %v3175_v22  ;;  %2122 = vmatpush.bf16.msrb.mxu1 %v3179_v23  ;;  %v3461_v22 = vld [vmem:[%s5226_s9 + $0x1b8] sm:$0xf0]  ;;  %v3239_v23 = vor.u32 %v3510_v16, %v3238_v15 }
 0x2c3   :  { %2079 = vmatpush.bf16.msra.mxu3 %v2979_v28  ;;  %2107 = vmatpush.bf16.msra.mxu2 %v2983_v29  ;;  %v3043_v28 = vor.u32 %v3461_v22, %v3042_v21  ;;  %v3014_v29 = vld [vmem:[%s5226_s9 + $0x168] sm:$0xf] }
 0x2c4   :  { %2043 = vmatmul.bf16.vlgmr.msrb.gmra.mxu0 %v4911_v52  ;;  %2071 = vmatmul.bf16.vlgmr.msra.gmra.mxu1 %v4911_v52 }
 0x2c5   :  { %2095 = vmatpush.bf16.msra.mxu0 %v3147_v34  ;;  %2123 = vmatpush.bf16.msrb.mxu1 %v3151_v35  ;;  %v3015_v34 = vor.u32 %v3454_v30, %v3014_v29  ;;  %v2986_v35 = vld [vmem:[%s5226_s9 + $0x130] sm:$0xf]  ;;  %v1377_v29 = vperm.slane %v5205_v63, 2  ;;  %v1378_v30 = vperm.slane %v5205_v63, 3 }
 0x2c7   :  { %2080 = vmatpush.bf16.msra.mxu3 %v2951_v41  ;;  %2108 = vmatpush.bf16.msra.mxu2 %v2955_v42  ;;  %v2987_v41 = vor.u32 %v3447_v36, %v2986_v35  ;;  %v2958_v42 = vld [vmem:[%s5226_s9 + $0xf8] sm:$0xf] }
 0x2c9   :  { %2096 = vmatpush.bf16.msra.mxu0 %v3119_v49  ;;  %2124 = vmatpush.bf16.msrb.mxu1 %v3123_v50  ;;  %v2959_v49 = vor.u32 %v3440_v43, %v2958_v42  ;;  %v2930_v50 = vld [vmem:[%s5226_s9 + $0xc0] sm:$0xf] }
 0x2ca   :  { %2029 = vmatmul.bf16.vlgmr.msrb.gmra.mxu3 %v4951_v48  ;;  %2057 = vmatmul.bf16.vlgmr.msrb.gmra.mxu2 %v4951_v48 }
 0x2cb   :  { %2081 = vmatpush.bf16.msra.mxu3 %v2923_v57  ;;  %2109 = vmatpush.bf16.msra.mxu2 %v2927_v58  ;;  %v2931_v57 = vor.u32 %v3433_v51, %v2930_v50  ;;  %v2902_v58 = vld [vmem:[%s5226_s9 + $0x88] sm:$0xf] }
 0x2cd   :  { %2097 = vmatpush.bf16.msra.mxu0 %v3091_v1  ;;  %2125 = vmatpush.bf16.msrb.mxu1 %v3095_v2  ;;  %v2903_v1 = vor.u32 %v3426_v59, %v2902_v58  ;;  %v2874_v2 = vld [vmem:[%s5226_s9 + $0x50] sm:$0xf] }
 0x2ce   :  { %v2875_v6 = vor.u32 %v3419_v3, %v2874_v2 }
 0x2cf   :  { %2082 = vmatpush.bf16.msra.mxu3 %v2895_v7  ;;  %2110 = vmatpush.bf16.msra.mxu2 %v2899_v8  ;;  %v3412_v7 = vld [vmem:[%s5226_s9 + $0x30] sm:$0xf0]  ;;  %s3605_s9 = smov [#allocation2]  }
 0x2d0   :  { %v2847_v8 = vor.u32 %v3412_v7, %v2846_v4  ;;  %v1379_v7 = vperm.slane %v5205_v63, 4  ;;  %s2252_s10 = sshll.u32 %s3605_s9, 4  ;;  %s2253_s10 = int_to_ptr.vmem [resolvable:$true] %s2252_s10 }
 0x2d1   :  { %2098 = vmatpush.bf16.msra.mxu0 %v3063_v11  ;;  %2126 = vmatpush.bf16.msrb.mxu1 %v3067_v12 }
 0x2d3   :  { %2083 = vmatpush.bf16.msra.mxu3 %v2867_v9  ;;  %2111 = vmatpush.bf16.msra.mxu2 %v2871_v14 }
 0x2d4   :  { %2099 = vmatmul.bf16.vlgmr.msra.gmra.mxu0 %v4911_v52  ;;  %2127 = vmatmul.bf16.vlgmr.msrb.gmra.mxu1 %v4911_v52 }
 0x2d5   :  { %2147 = vmatpush.bf16.msrb.mxu0 %v3267_v13 }
 0x2d7   :  { %2084 = vmatpush.bf16.msra.mxu3 %v2839_v24  ;;  %2112 = vmatpush.bf16.msra.mxu2 %v2843_v25 }
 0x2d9   :  { %2148 = vmatpush.bf16.msrb.mxu0 %v3239_v23 }
 0x2da   :  { %2085 = vmatmul.bf16.vlgmr.msra.gmra.mxu3 %v4951_v48  ;;  %2113 = vmatmul.bf16.vlgmr.msra.gmra.mxu2 %v4951_v48 }
 0x2db   :  { %2133 = vmatpush.bf16.msrb.mxu3 %v3043_v28 }
 0x2dd   :  { %2149 = vmatpush.bf16.msrb.mxu0 %v3211_v31 }
 0x2df   :  { %2134 = vmatpush.bf16.msrb.mxu3 %v3015_v34 }
 0x2e1   :  { %2150 = vmatpush.bf16.msrb.mxu0 %v3183_v38 }
 0x2e3   :  { %2135 = vmatpush.bf16.msrb.mxu3 %v2987_v41 }
 0x2e5   :  { %2151 = vmatpush.bf16.msrb.mxu0 %v3155_v45 }
 0x2e7   :  { %2136 = vmatpush.bf16.msrb.mxu3 %v2959_v49 }
 0x2e9   :  { %2152 = vmatpush.bf16.msrb.mxu0 %v3127_v53 }
 0x2eb   :  { %2137 = vmatpush.bf16.msrb.mxu3 %v2931_v57 }
 0x2ed   :  { %2153 = vmatpush.bf16.msrb.mxu0 %v3099_v61 }
 0x2ef   :  { %2138 = vmatpush.bf16.msrb.mxu3 %v2903_v1 }
 0x2f1   :  { %2154 = vmatpush.bf16.msrb.mxu0 %v3071_v5 }
 0x2f3   :  { %2139 = vmatpush.bf16.msrb.mxu3 %v2875_v6 }
 0x2f4   :  { %2155 = vmatmul.bf16.vlgmr.msrb.gmra.mxu0 %v4911_v52 }
 0x2f7   :  { %2140 = vmatpush.bf16.msrb.mxu3 %v2847_v8  ;;  %v1380_v8 = vperm.slane %v5205_v63, 5 }
 0x2fa   :  { %2141 = vmatmul.bf16.vlgmr.msrb.gmra.mxu3 %v4951_v48 }
 0x331   :  { %v1988_v54 = vpop.f32.mrf.mxu0  ;;  %v2016_v37 = vpop.f32.mrf.mxu1 }
 0x339   :  { %v1990_v9 = vpop.f32.mrf.mxu0  ;;  %v2018_v52 = vpop.f32.mrf.mxu1 }
 0x33d   :  { %v1974_v10 = vpop.f32.mrf.mxu3  ;;  %v2002_v11 = vpop.f32.mrf.mxu2 }
 0x33e   :  { %v1975_v12 = vadd.f32 %v1974_v10, %v1375_v44  ;;  %v2003_v13 = vadd.f32 %v2002_v11, %v1376_v60 }
 0x340   :  { %v1989_v14 = vadd.f32 %v1988_v54, %v1975_v12  ;;  %v2017_v15 = vadd.f32 %v2016_v37, %v2003_v13 }
 0x341   :  { %v2044_v25 = vpop.f32.mrf.mxu0  ;;  %v2072_v26 = vpop.f32.mrf.mxu1 }
 0x342   :  { %v2161_v48 = vsub.f32 0.0, %v1989_v14  ;;  %v2162_v16 = vsub.f32 0.0, %v2017_v15 }
 0x344   :  { %v2175_v17 = vmul.f32 1.442695, %v2161_v48  ;;  %v2177_v18 = vmul.f32 1.442695, %v2162_v16 }
 0x345   :  { %v1976_v19 = vpop.f32.mrf.mxu3  ;;  %v2004_v20 = vpop.f32.mrf.mxu2 }
 0x346   :  { %3523 = vpow2.f32 %v2175_v17  ;;  %v1977_v21 = vadd.f32 %v1976_v19, %v1375_v44  ;;  %v2005_v22 = vadd.f32 %v2004_v20, %v1376_v60 }
 0x347   :  { %3525 = vpow2.f32 %v2177_v18 }
 0x348   :  { %v1991_v23 = vadd.f32 %v1990_v9, %v1977_v21  ;;  %v2019_v24 = vadd.f32 %v2018_v52, %v2005_v22 }
 0x349   :  { %v2046_v47 = vpop.f32.mrf.mxu0  ;;  %v2074_v50 = vpop.f32.mrf.mxu1 }
 0x34a   :  { %v2168_v27 = vsub.f32 0.0, %v1991_v23  ;;  %v2169_v28 = vsub.f32 0.0, %v2019_v24 }
 0x34c   :  { %v3524_v31 = vpop.eup %3523  ;;  %v2189_v32 = vmul.f32 1.442695, %v2168_v27  ;;  %v2191_v35 = vmul.f32 1.442695, %v2169_v28 }
 0x34d   :  { %v3526_v33 = vpop.eup %3525  ;;  %v2203_v34 = vadd.f32 1.0, %v3524_v31  ;;  %v2030_v36 = vpop.f32.mrf.mxu3 }
 0x34e   :  { %v2058_v38 = vpop.f32.mrf.mxu2  ;;  %v2204_v39 = vadd.f32 1.0, %v3526_v33  ;;  %3527 = vpow2.f32 %v2189_v32  ;;  %v2031_v40 = vadd.f32 %v2030_v36, %v1377_v29 }
 0x34f   :  { %v2059_v41 = vadd.f32 %v2058_v38, %v1378_v30  ;;  %3529 = vrcp.f32 %v2203_v34 }
 0x350   :  { %3531 = vrcp.f32 %v2204_v39  ;;  %v2045_v42 = vadd.f32 %v2044_v25, %v2031_v40 }
 0x351   :  { %v2073_v43 = vadd.f32 %v2072_v26, %v2059_v41  ;;  %3533 = vpow2.f32 %v2191_v35  ;;  %v2100_v11 = vpop.f32.mrf.mxu0  ;;  %v2128_v9 = vpop.f32.mrf.mxu1 }
 0x352   :  { %v2163_v45 = vsub.f32 0.0, %v2045_v42 }
 0x353   :  { %v2164_v46 = vsub.f32 0.0, %v2073_v43 }
 0x354   :  { %v3528_v49 = vpop.eup %3527  ;;  %v2179_v51 = vmul.f32 1.442695, %v2163_v45 }
 0x355   :  { %v2181_v53 = vmul.f32 1.442695, %v2164_v46  ;;  %v3530_v55 = vpop.eup %3529  ;;  %v2210_v56 = vadd.f32 1.0, %v3528_v49  ;;  %v2032_v57 = vpop.f32.mrf.mxu3 }
 0x356   :  { %v2060_v58 = vpop.f32.mrf.mxu2  ;;  %v3532_v59 = vpop.eup %3531  ;;  %3535 = vpow2.f32 %v2179_v51  ;;  %v2033_v61 = vadd.f32 %v2032_v57, %v1377_v29 }
 0x357   :  { %v2061_v62 = vadd.f32 %v2060_v58, %v1378_v30  ;;  %v3534_v0 = vpop.eup %3533  ;;  %v2231_v1 = vpack.c.bf16 %v3532_v59, %v3530_v55  ;;  %3537 = vrcp.f32 %v2210_v56 }
 0x358   :  { %v2211_v2 = vadd.f32 1.0, %v3534_v0  ;;  %3539 = vpow2.f32 %v2181_v53  ;;  %v2047_v3 = vadd.f32 %v2046_v47, %v2033_v61 }
 0x359   :  { %v2075_v5 = vadd.f32 %v2074_v50, %v2061_v62  ;;  %2239 = vst [vmem:[#allocation2] sm:$0xff] %v2231_v1  ;;  %v2102_v33 = vpop.f32.mrf.mxu0  ;;  %v2130_v36 = vpop.f32.mrf.mxu1  ;;  %v1381_v62 = vperm.slane %v5205_v63, 6 }
 0x35a   :  { %3541 = vrcp.f32 %v2211_v2  ;;  %v2170_v6 = vsub.f32 0.0, %v2047_v3 }
 0x35b   :  { %v2171_v4 = vsub.f32 0.0, %v2075_v5 }
 0x35c   :  { %v3536_v54 = vpop.eup %3535  ;;  %v2193_v37 = vmul.f32 1.442695, %v2170_v6 }
 0x35d   :  { %v2195_v44 = vmul.f32 1.442695, %v2171_v4  ;;  %v3538_v60 = vpop.eup %3537  ;;  %v2205_v10 = vadd.f32 1.0, %v3536_v54  ;;  %v2086_v12 = vpop.f32.mrf.mxu3 }
 0x35e   :  { %v3540_v13 = vpop.eup %3539  ;;  %3543 = vpow2.f32 %v2193_v37  ;;  %v2087_v52 = vadd.f32 %v2086_v12, %v1379_v7  ;;  %v2114_v14 = vpop.f32.mrf.mxu2 }
 0x35f   :  { %3545 = vrcp.f32 %v2205_v10  ;;  %v2206_v15 = vadd.f32 1.0, %v3540_v13  ;;  %v2115_v48 = vadd.f32 %v2114_v14, %v1380_v8 }
 0x360   :  { %v3542_v16 = vpop.eup %3541  ;;  %3547 = vpow2.f32 %v2195_v44  ;;  %v2101_v17 = vadd.f32 %v2100_v11, %v2087_v52 }
 0x361   :  { %v2235_v18 = vpack.c.bf16 %v3542_v16, %v3538_v60  ;;  %3549 = vrcp.f32 %v2206_v15  ;;  %v2129_v19 = vadd.f32 %v2128_v9, %v2115_v48 }
 0x362   :  { %v2165_v20 = vsub.f32 0.0, %v2101_v17 }
 0x363   :  { %2244 = vst [vmem:[#allocation2 + $0x1c] sm:$0xff] %v2235_v18  ;;  %v2166_v21 = vsub.f32 0.0, %v2129_v19 }
 0x364   :  { %v3544_v22 = vpop.eup %3543  ;;  %v2183_v23 = vmul.f32 1.442695, %v2165_v20 }
 0x365   :  { %v3546_v24 = vpop.eup %3545  ;;  %v2212_v25 = vadd.f32 1.0, %v3544_v22  ;;  %v2185_v26 = vmul.f32 1.442695, %v2166_v21  ;;  %v2088_v27 = vpop.f32.mrf.mxu3 }
 0x366   :  { %v3548_v28 = vpop.eup %3547  ;;  %3551 = vpow2.f32 %v2183_v23  ;;  %v2089_v29 = vadd.f32 %v2088_v27, %v1379_v7  ;;  %v2116_v30 = vpop.f32.mrf.mxu2 }
 0x367   :  { %v3550_v31 = vpop.eup %3549  ;;  %3553 = vrcp.f32 %v2212_v25  ;;  %v2213_v32 = vadd.f32 1.0, %v3548_v28  ;;  %v2117_v34 = vadd.f32 %v2116_v30, %v1380_v8 }
 0x368   :  { %v2232_v35 = vpack.c.bf16 %v3550_v31, %v3546_v24  ;;  %3555 = vpow2.f32 %v2185_v26  ;;  %v2103_v38 = vadd.f32 %v2102_v33, %v2089_v29 }
 0x369   :  { %3557 = vrcp.f32 %v2213_v32  ;;  %v2131_v39 = vadd.f32 %v2130_v36, %v2117_v34 }
 0x36a   :  { %2240 = vst [vmem:[#allocation2 + $0x8] sm:$0xff] %v2232_v35  ;;  %v2172_v40 = vsub.f32 0.0, %v2103_v38 }
 0x36b   :  { %v2173_v41 = vsub.f32 0.0, %v2131_v39 }
 0x36c   :  { %v3552_v42 = vpop.eup %3551  ;;  %v2197_v43 = vmul.f32 1.442695, %v2172_v40 }
 0x36d   :  { %v3554_v45 = vpop.eup %3553  ;;  %v2207_v46 = vadd.f32 1.0, %v3552_v42  ;;  %v2199_v47 = vmul.f32 1.442695, %v2173_v41 }
 0x36e   :  { %v3556_v49 = vpop.eup %3555  ;;  %3559 = vpow2.f32 %v2197_v43 }
 0x36f   :  { %v3558_v50 = vpop.eup %3557  ;;  %3561 = vrcp.f32 %v2207_v46  ;;  %v2208_v51 = vadd.f32 1.0, %v3556_v49 }
 0x370   :  { %v2236_v53 = vpack.c.bf16 %v3558_v50, %v3554_v45  ;;  %3563 = vpow2.f32 %v2199_v47 }
 0x371   :  { %3565 = vrcp.f32 %v2208_v51  ;;  %v2156_v1 = vpop.f32.mrf.mxu0 }
 0x372   :  { %2245 = vst [vmem:[#allocation2 + $0x24] sm:$0xff] %v2236_v53 }
 0x374   :  { %v3560_v55 = vpop.eup %3559 }
 0x375   :  { %v3562_v56 = vpop.eup %3561  ;;  %v2214_v57 = vadd.f32 1.0, %v3560_v55 }
 0x376   :  { %v3564_v58 = vpop.eup %3563 }
 0x377   :  { %v3566_v59 = vpop.eup %3565  ;;  %3567 = vrcp.f32 %v2214_v57  ;;  %v2215_v61 = vadd.f32 1.0, %v3564_v58 }
 0x378   :  { %v2233_v0 = vpack.c.bf16 %v3566_v59, %v3562_v56 }
 0x379   :  { %3569 = vrcp.f32 %v2215_v61  ;;  %v2158_v60 = vpop.f32.mrf.mxu0 }
 0x37a   :  { %2241 = vst [vmem:[#allocation2 + $0x10] sm:$0xff] %v2233_v0 }
 0x37d   :  { %v2142_v2 = vpop.f32.mrf.mxu3  ;;  %v3568_v5 = vpop.eup %3567 }
 0x37e   :  { %v2143_v3 = vadd.f32 %v2142_v2, %v1381_v62 }
 0x37f   :  { %v3570_v4 = vpop.eup %3569 }
 0x380   :  { %v2157_v6 = vadd.f32 %v2156_v1, %v2143_v3  ;;  %v2237_v8 = vpack.c.bf16 %v3570_v4, %v3568_v5 }
 0x382   :  { %v2167_v7 = vsub.f32 0.0, %v2157_v6  ;;  %2246 = vst [vmem:[#allocation2 + $0x2c] sm:$0xff] %v2237_v8 }
 0x384   :  { %v2187_v54 = vmul.f32 1.442695, %v2167_v7 }
 0x385   :  { %v2144_v37 = vpop.f32.mrf.mxu3 }
 0x386   :  { %3571 = vpow2.f32 %v2187_v54  ;;  %v2145_v44 = vadd.f32 %v2144_v37, %v1381_v62 }
 0x388   :  { %v2159_v10 = vadd.f32 %v2158_v60, %v2145_v44 }
 0x38a   :  { %v2174_v11 = vsub.f32 0.0, %v2159_v10 }
 0x38c   :  { %v3572_v63 = vpop.eup %3571  ;;  %v2201_v12 = vmul.f32 1.442695, %v2174_v11 }
 0x38d   :  { %v2209_v13 = vadd.f32 1.0, %v3572_v63 }
 0x38e   :  { %3573 = vpow2.f32 %v2201_v12 }
 0x38f   :  { %3575 = vrcp.f32 %v2209_v13 }
 0x394   :  { %v3574_v9 = vpop.eup %3573 }
 0x395   :  { %v3576_v52 = vpop.eup %3575  ;;  %v2216_v14 = vadd.f32 1.0, %v3574_v9 }
 0x396   :  { %v2234_v15 = vpack.c.bf16 %v3576_v52, %v3576_v52 }
 0x397   :  { %3577 = vrcp.f32 %v2216_v14 }
 0x398   :  { %2243 = vst.msk [vmem:[#allocation2 + $0x18] sm:$0xf] %vm2242_vm1, %v2234_v15 }
 0x39d   :  { %v3578_v48 = vpop.eup %3577 }
 0x39e   :  { %v2238_v16 = vpack.c.bf16 %v3578_v48, %v3578_v48 }
 0x3a0   :  { %2247 = vst.msk [vmem:[#allocation2 + $0x34] sm:$0xf] %vm2242_vm1, %v2238_v16 }
 0x3a1   :  { %2260 = dma.vmem_to_hbm [thread:$0]  %s2253_s10, 896, %s2255_s25, [#allocation3], %s3606_s26, %s3606_s26, %s3607_s27  }
 0x3a2   :  { %3603 = dma.done.wait [#allocation3], 896  }
 0x3a3   :  { %3604 = vsyncadd [#allocation3], 4294966400 }
 0x3a4   :  { %2265 = vsyncpa [#allocation3], 1 }

</bundles_post_ra>
